<compile_context>
chip_gen: v7x
topology: tpu7x:2x2x1
jax: 0.10.0
libtpu: 0.0.40
codegen_flags: <defaults>
</compile_context>

<pallas_src>
import jax
import jax.numpy as jnp
from jax import lax
from jax.experimental import pallas as pl
from jax.experimental.pallas import tpu as pltpu


def _make_kernel(seq_len: int, vocab: int, batch_tile: int):
    inv_s = 1.0 / float(seq_len)

    def kernel(ids_ref, emb_ref, w1_ref, b1_ref, w2t_ref, b2t_ref,
               out_ref, pooled_ref):
        # ids_ref   : SMEM  [Bp*S]   int32   scalar-prefetched token ids (flat)
        # emb_ref   : VMEM  [V, E]   f32     embedding table (resident)
        # w1_ref    : VMEM  [E, H]   bf16
        # b1_ref    : VMEM  [1, H]   f32
        # w2t_ref   : VMEM  [O, H]   bf16    fc2 weight, transposed
        # b2t_ref   : VMEM  [O, 1]   f32     fc2 bias, transposed
        # out_ref   : VMEM  [O, Bt]  f32     lane-dense output (batch on lanes)
        # pooled_ref: VMEM  [Bt, E]  f32     scratch: mean-pooled embeddings
        tile = pl.program_id(0)
        row0 = tile * batch_tile
        emb_dim = emb_ref.shape[1]

        def pool_one_row(b, carry):
            base = (row0 + b) * seq_len
            acc = jnp.zeros((1, emb_dim), jnp.float32)
            for s in range(seq_len):               # static small S -> unrolled
                tok = ids_ref[base + s]
                tok = jnp.clip(tok, 0, vocab - 1)  # guard untrusted ids
                acc = acc + emb_ref[pl.ds(tok, 1), :].astype(jnp.float32)
            pooled_ref[pl.ds(b, 1), :] = acc * inv_s
            return carry

        lax.fori_loop(0, batch_tile, pool_one_row, 0,
                      unroll=batch_tile <= 16)

        pooled = pooled_ref[...]                                      # [Bt, E] f32
        # fc1 + ReLU (bf16 operands, f32 accumulation)
        h = jnp.dot(pooled.astype(jnp.bfloat16), w1_ref[...],
                    preferred_element_type=jnp.float32) + b1_ref[...]  # [Bt, H]
        h = jnp.maximum(h, 0.0)
        # fc2 emitted transposed ([O, Bt]) so the store is lane-dense in batch.
        logits_t = lax.dot_general(
            w2t_ref[...], h.astype(jnp.bfloat16),
            dimension_numbers=(((1,), (1,)), ((), ())),
            preferred_element_type=jnp.float32) + b2t_ref[...]         # [O, Bt]
        out_ref[...] = jax.nn.sigmoid(logits_t).astype(out_ref.dtype)

    return kernel


def sentiment_analyser(x_ids, emb, w1, b1, w2, b2, *, batch_tile=128):
    """Forward pass of SentimentAnalyser.

    x_ids: [B, S] integer token ids.
    emb:   [V, E] embedding table.
    w1,b1: fc1 params, shapes [E, H], [1, H] (or [H]).
    w2,b2: fc2 params, shapes [H, O], [1, O] (or [O]).
    Returns sigmoid probabilities, [B, O] float32.
    """
    B, S = x_ids.shape
    V, E = emb.shape
    H = w1.shape[1]
    O = w2.shape[1]

    # Batch tiling: single tile if the batch is small, else 128-row tiles
    # (keeps the (8,128) lane constraint on the [O, Bt] output block).
    if B <= batch_tile:
        bt, Bp = B, B
    else:
        bt = batch_tile
        Bp = pl.cdiv(B, bt) * bt

    ids = x_ids.astype(jnp.int32)
    if Bp != B:
        ids = jnp.pad(ids, ((0, Bp - B), (0, 0)))     # padded rows sliced off below
    ids_flat = ids.reshape(-1)                        # 1-D -> compact SMEM layout

    emb_f32 = emb.astype(jnp.float32)
    w1_bf = w1.astype(jnp.bfloat16)                   # halve weight DMA bytes
    w2t_bf = jnp.transpose(w2).astype(jnp.bfloat16)   # [O, H]
    b1_f = jnp.reshape(b1, (1, H)).astype(jnp.float32)
    b2t_f = jnp.reshape(b2, (O, 1)).astype(jnp.float32)

    kernel = _make_kernel(seq_len=S, vocab=V, batch_tile=bt)

    grid_spec = pltpu.PrefetchScalarGridSpec(
        num_scalar_prefetch=1,
        grid=(Bp // bt,),
        in_specs=[
            pl.BlockSpec((V, E), lambda i, _ids: (0, 0)),   # emb (resident)
            pl.BlockSpec((E, H), lambda i, _ids: (0, 0)),   # w1
            pl.BlockSpec((1, H), lambda i, _ids: (0, 0)),   # b1
            pl.BlockSpec((O, H), lambda i, _ids: (0, 0)),   # w2^T
            pl.BlockSpec((O, 1), lambda i, _ids: (0, 0)),   # b2^T
        ],
        out_specs=pl.BlockSpec((O, bt), lambda i, _ids: (0, i)),
        scratch_shapes=[pltpu.VMEM((bt, E), jnp.float32)],
    )

    out_t = pl.pallas_call(
        kernel,
        out_shape=jax.ShapeDtypeStruct((O, Bp), jnp.float32),
        grid_spec=grid_spec,
        compiler_params=pltpu.CompilerParams(
            dimension_semantics=("parallel",),
            vmem_limit_bytes=32 * 1024 * 1024,
        ),
    )(ids_flat, emb_f32, w1_bf, b1_f, w2t_bf, b2t_f)

    return jnp.transpose(out_t[:, :B])                # [B, O]


if __name__ == "__main__":
    # Small, module-consistent shapes.
    B, S = 8, 8
    vocab_size, embedding_dim, hidden_dim, output_dim = 64, 32, 32, 1

    key = jax.random.PRNGKey(0)
    k_ids, k_emb, k_w1, k_b1, k_w2, k_b2 = jax.random.split(key, 6)

    x_ids = jax.random.randint(k_ids, (B, S), 0, vocab_size, dtype=jnp.int32)

    # Deterministic synthetic parameters (shapes match nn.Embedding / nn.Linear).
    emb = jax.random.normal(k_emb, (vocab_size, embedding_dim), jnp.float32) * 0.1
    w1 = jax.random.normal(k_w1, (embedding_dim, hidden_dim), jnp.float32) * 0.1
    b1 = jax.random.normal(k_b1, (1, hidden_dim), jnp.float32) * 0.1
    w2 = jax.random.normal(k_w2, (hidden_dim, output_dim), jnp.float32) * 0.1
    b2 = jax.random.normal(k_b2, (1, output_dim), jnp.float32) * 0.1

    out = jax.block_until_ready(sentiment_analyser(x_ids, emb, w1, b1, w2, b2))

    # Pure-JAX f32 reference of the exact forward semantics (kernel uses bf16
    # fc weights with f32 accumulation -> slightly relaxed tolerance).
    pooled_ref = jnp.mean(emb[x_ids], axis=1)
    h_ref = jnp.maximum(pooled_ref @ w1 + b1, 0.0)
    ref = jax.nn.sigmoid(h_ref @ w2 + b2)

    assert out.shape == (B, output_dim)
    assert jnp.allclose(out, ref, atol=1e-2, rtol=1e-2), float(
        jnp.max(jnp.abs(out - ref)))

    print("KERNEL_OK")
</pallas_src>

<mosaic_0001>
module attributes {stable_mosaic.version = 11 : i64} {
  func.func @kernel(%arg0: i32, %arg1: memref<64xi32, #tpu.memory_space<smem>>, %arg2: memref<64x32xf32, #tpu.memory_space<vmem>>, %arg3: memref<32x32xbf16, #tpu.memory_space<vmem>>, %arg4: memref<1x32xf32, #tpu.memory_space<vmem>>, %arg5: memref<1x32xbf16, #tpu.memory_space<vmem>>, %arg6: memref<1x1xf32, #tpu.memory_space<vmem>>, %arg7: memref<1x8xf32, #tpu.memory_space<vmem>>, %arg8: memref<8x32xf32, #tpu.memory_space<vmem>>) attributes {dimension_semantics = [#tpu.dimension_semantics<parallel>], iteration_bounds = array<i64: 1>, scalar_prefetch = 1 : i64, scratch_operands = 1 : i64, tpu.core_type = #tpu.core_type<tc>, window_params = [{pipeline_mode = #tpu.pipeline_mode<synchronous>, transform_indices = @transform_0, window_bounds = array<i64: 64, 32>}, {pipeline_mode = #tpu.pipeline_mode<synchronous>, transform_indices = @transform_1, window_bounds = array<i64: 32, 32>}, {pipeline_mode = #tpu.pipeline_mode<synchronous>, transform_indices = @transform_2, window_bounds = array<i64: 1, 32>}, {pipeline_mode = #tpu.pipeline_mode<synchronous>, transform_indices = @transform_3, window_bounds = array<i64: 1, 32>}, {pipeline_mode = #tpu.pipeline_mode<synchronous>, transform_indices = @transform_4, window_bounds = array<i64: 1, 1>}, {transform_indices = @transform_5, window_bounds = array<i64: 1, 8>}]} {
    %c8_i32 = arith.constant 8 : i32
    %0 = arith.muli %arg0, %c8_i32 : i32
    %c0_i32 = arith.constant 0 : i32
    %1 = arith.addi %0, %c0_i32 : i32
    %c8_i32_0 = arith.constant 8 : i32
    %2 = arith.muli %1, %c8_i32_0 : i32
    %cst = arith.constant 0.000000e+00 : f32
    %3 = vector.broadcast %cst : f32 to vector<1x32xf32>
    %c0_i32_1 = arith.constant 0 : i32
    %4 = arith.addi %2, %c0_i32_1 : i32
    %5 = arith.index_cast %4 : i32 to index
    %6 = memref.load %arg1[%5] : memref<64xi32, #tpu.memory_space<smem>>
    %c0_i32_2 = arith.constant 0 : i32
    %c63_i32 = arith.constant 63 : i32
    %7 = arith.maxsi %c0_i32_2, %6 : i32
    %8 = arith.minsi %c63_i32, %7 : i32
    %9 = arith.index_cast %8 : i32 to index
    %c0 = arith.constant 0 : index
    %10 = vector.load %arg2[%9, %c0] : memref<64x32xf32, #tpu.memory_space<vmem>>, vector<1x32xf32>
    %11 = arith.addf %3, %10 : vector<1x32xf32>
    %c1_i32 = arith.constant 1 : i32
    %12 = arith.addi %2, %c1_i32 : i32
    %13 = arith.index_cast %12 : i32 to index
    %14 = memref.load %arg1[%13] : memref<64xi32, #tpu.memory_space<smem>>
    %c0_i32_3 = arith.constant 0 : i32
    %c63_i32_4 = arith.constant 63 : i32
    %15 = arith.maxsi %c0_i32_3, %14 : i32
    %16 = arith.minsi %c63_i32_4, %15 : i32
    %17 = arith.index_cast %16 : i32 to index
    %c0_5 = arith.constant 0 : index
    %18 = vector.load %arg2[%17, %c0_5] : memref<64x32xf32, #tpu.memory_space<vmem>>, vector<1x32xf32>
    %19 = arith.addf %11, %18 : vector<1x32xf32>
    %c2_i32 = arith.constant 2 : i32
    %20 = arith.addi %2, %c2_i32 : i32
    %21 = arith.index_cast %20 : i32 to index
    %22 = memref.load %arg1[%21] : memref<64xi32, #tpu.memory_space<smem>>
    %c0_i32_6 = arith.constant 0 : i32
    %c63_i32_7 = arith.constant 63 : i32
    %23 = arith.maxsi %c0_i32_6, %22 : i32
    %24 = arith.minsi %c63_i32_7, %23 : i32
    %25 = arith.index_cast %24 : i32 to index
    %c0_8 = arith.constant 0 : index
    %26 = vector.load %arg2[%25, %c0_8] : memref<64x32xf32, #tpu.memory_space<vmem>>, vector<1x32xf32>
    %27 = arith.addf %19, %26 : vector<1x32xf32>
    %c3_i32 = arith.constant 3 : i32
    %28 = arith.addi %2, %c3_i32 : i32
    %29 = arith.index_cast %28 : i32 to index
    %30 = memref.load %arg1[%29] : memref<64xi32, #tpu.memory_space<smem>>
    %c0_i32_9 = arith.constant 0 : i32
    %c63_i32_10 = arith.constant 63 : i32
    %31 = arith.maxsi %c0_i32_9, %30 : i32
    %32 = arith.minsi %c63_i32_10, %31 : i32
    %33 = arith.index_cast %32 : i32 to index
    %c0_11 = arith.constant 0 : index
    %34 = vector.load %arg2[%33, %c0_11] : memref<64x32xf32, #tpu.memory_space<vmem>>, vector<1x32xf32>
    %35 = arith.addf %27, %34 : vector<1x32xf32>
    %c4_i32 = arith.constant 4 : i32
    %36 = arith.addi %2, %c4_i32 : i32
    %37 = arith.index_cast %36 : i32 to index
    %38 = memref.load %arg1[%37] : memref<64xi32, #tpu.memory_space<smem>>
    %c0_i32_12 = arith.constant 0 : i32
    %c63_i32_13 = arith.constant 63 : i32
    %39 = arith.maxsi %c0_i32_12, %38 : i32
    %40 = arith.minsi %c63_i32_13, %39 : i32
    %41 = arith.index_cast %40 : i32 to index
    %c0_14 = arith.constant 0 : index
    %42 = vector.load %arg2[%41, %c0_14] : memref<64x32xf32, #tpu.memory_space<vmem>>, vector<1x32xf32>
    %43 = arith.addf %35, %42 : vector<1x32xf32>
    %c5_i32 = arith.constant 5 : i32
    %44 = arith.addi %2, %c5_i32 : i32
    %45 = arith.index_cast %44 : i32 to index
    %46 = memref.load %arg1[%45] : memref<64xi32, #tpu.memory_space<smem>>
    %c0_i32_15 = arith.constant 0 : i32
    %c63_i32_16 = arith.constant 63 : i32
    %47 = arith.maxsi %c0_i32_15, %46 : i32
    %48 = arith.minsi %c63_i32_16, %47 : i32
    %49 = arith.index_cast %48 : i32 to index
    %c0_17 = arith.constant 0 : index
    %50 = vector.load %arg2[%49, %c0_17] : memref<64x32xf32, #tpu.memory_space<vmem>>, vector<1x32xf32>
    %51 = arith.addf %43, %50 : vector<1x32xf32>
    %c6_i32 = arith.constant 6 : i32
    %52 = arith.addi %2, %c6_i32 : i32
    %53 = arith.index_cast %52 : i32 to index
    %54 = memref.load %arg1[%53] : memref<64xi32, #tpu.memory_space<smem>>
    %c0_i32_18 = arith.constant 0 : i32
    %c63_i32_19 = arith.constant 63 : i32
    %55 = arith.maxsi %c0_i32_18, %54 : i32
    %56 = arith.minsi %c63_i32_19, %55 : i32
    %57 = arith.index_cast %56 : i32 to index
    %c0_20 = arith.constant 0 : index
    %58 = vector.load %arg2[%57, %c0_20] : memref<64x32xf32, #tpu.memory_space<vmem>>, vector<1x32xf32>
    %59 = arith.addf %51, %58 : vector<1x32xf32>
    %c7_i32 = arith.constant 7 : i32
    %60 = arith.addi %2, %c7_i32 : i32
    %61 = arith.index_cast %60 : i32 to index
    %62 = memref.load %arg1[%61] : memref<64xi32, #tpu.memory_space<smem>>
    %c0_i32_21 = arith.constant 0 : i32
    %c63_i32_22 = arith.constant 63 : i32
    %63 = arith.maxsi %c0_i32_21, %62 : i32
    %64 = arith.minsi %c63_i32_22, %63 : i32
    %65 = arith.index_cast %64 : i32 to index
    %c0_23 = arith.constant 0 : index
    %66 = vector.load %arg2[%65, %c0_23] : memref<64x32xf32, #tpu.memory_space<vmem>>, vector<1x32xf32>
    %67 = arith.addf %59, %66 : vector<1x32xf32>
    %cst_24 = arith.constant 1.250000e-01 : f32
    %68 = vector.broadcast %cst_24 : f32 to vector<1x32xf32>
    %69 = arith.mulf %67, %68 : vector<1x32xf32>
    %70 = arith.index_cast %c0_i32 : i32 to index
    %c0_25 = arith.constant 0 : index
    %71 = vector.load %arg8[%70, %c0_25] : memref<8x32xf32, #tpu.memory_space<vmem>>, vector<1x32xf32>
    tpu.vector_store %arg8[%70, %c0_25], %69 {strides = array<i32>} : memref<8x32xf32, #tpu.memory_space<vmem>>, vector<1x32xf32>,
    %c1_i32_26 = arith.constant 1 : i32
    %72 = arith.addi %0, %c1_i32_26 : i32
    %c8_i32_27 = arith.constant 8 : i32
    %73 = arith.muli %72, %c8_i32_27 : i32
    %cst_28 = arith.constant 0.000000e+00 : f32
    %74 = vector.broadcast %cst_28 : f32 to vector<1x32xf32>
    %c0_i32_29 = arith.constant 0 : i32
    %75 = arith.addi %73, %c0_i32_29 : i32
    %76 = arith.index_cast %75 : i32 to index
    %77 = memref.load %arg1[%76] : memref<64xi32, #tpu.memory_space<smem>>
    %c0_i32_30 = arith.constant 0 : i32
    %c63_i32_31 = arith.constant 63 : i32
    %78 = arith.maxsi %c0_i32_30, %77 : i32
    %79 = arith.minsi %c63_i32_31, %78 : i32
    %80 = arith.index_cast %79 : i32 to index
    %c0_32 = arith.constant 0 : index
    %81 = vector.load %arg2[%80, %c0_32] : memref<64x32xf32, #tpu.memory_space<vmem>>, vector<1x32xf32>
    %82 = arith.addf %74, %81 : vector<1x32xf32>
    %c1_i32_33 = arith.constant 1 : i32
    %83 = arith.addi %73, %c1_i32_33 : i32
    %84 = arith.index_cast %83 : i32 to index
    %85 = memref.load %arg1[%84] : memref<64xi32, #tpu.memory_space<smem>>
    %c0_i32_34 = arith.constant 0 : i32
    %c63_i32_35 = arith.constant 63 : i32
    %86 = arith.maxsi %c0_i32_34, %85 : i32
    %87 = arith.minsi %c63_i32_35, %86 : i32
    %88 = arith.index_cast %87 : i32 to index
    %c0_36 = arith.constant 0 : index
    %89 = vector.load %arg2[%88, %c0_36] : memref<64x32xf32, #tpu.memory_space<vmem>>, vector<1x32xf32>
    %90 = arith.addf %82, %89 : vector<1x32xf32>
    %c2_i32_37 = arith.constant 2 : i32
    %91 = arith.addi %73, %c2_i32_37 : i32
    %92 = arith.index_cast %91 : i32 to index
    %93 = memref.load %arg1[%92] : memref<64xi32, #tpu.memory_space<smem>>
    %c0_i32_38 = arith.constant 0 : i32
    %c63_i32_39 = arith.constant 63 : i32
    %94 = arith.maxsi %c0_i32_38, %93 : i32
    %95 = arith.minsi %c63_i32_39, %94 : i32
    %96 = arith.index_cast %95 : i32 to index
    %c0_40 = arith.constant 0 : index
    %97 = vector.load %arg2[%96, %c0_40] : memref<64x32xf32, #tpu.memory_space<vmem>>, vector<1x32xf32>
    %98 = arith.addf %90, %97 : vector<1x32xf32>
    %c3_i32_41 = arith.constant 3 : i32
    %99 = arith.addi %73, %c3_i32_41 : i32
    %100 = arith.index_cast %99 : i32 to index
    %101 = memref.load %arg1[%100] : memref<64xi32, #tpu.memory_space<smem>>
    %c0_i32_42 = arith.constant 0 : i32
    %c63_i32_43 = arith.constant 63 : i32
    %102 = arith.maxsi %c0_i32_42, %101 : i32
    %103 = arith.minsi %c63_i32_43, %102 : i32
    %104 = arith.index_cast %103 : i32 to index
    %c0_44 = arith.constant 0 : index
    %105 = vector.load %arg2[%104, %c0_44] : memref<64x32xf32, #tpu.memory_space<vmem>>, vector<1x32xf32>
    %106 = arith.addf %98, %105 : vector<1x32xf32>
    %c4_i32_45 = arith.constant 4 : i32
    %107 = arith.addi %73, %c4_i32_45 : i32
    %108 = arith.index_cast %107 : i32 to index
    %109 = memref.load %arg1[%108] : memref<64xi32, #tpu.memory_space<smem>>
    %c0_i32_46 = arith.constant 0 : i32
    %c63_i32_47 = arith.constant 63 : i32
    %110 = arith.maxsi %c0_i32_46, %109 : i32
    %111 = arith.minsi %c63_i32_47, %110 : i32
    %112 = arith.index_cast %111 : i32 to index
    %c0_48 = arith.constant 0 : index
    %113 = vector.load %arg2[%112, %c0_48] : memref<64x32xf32, #tpu.memory_space<vmem>>, vector<1x32xf32>
    %114 = arith.addf %106, %113 : vector<1x32xf32>
    %c5_i32_49 = arith.constant 5 : i32
    %115 = arith.addi %73, %c5_i32_49 : i32
    %116 = arith.index_cast %115 : i32 to index
    %117 = memref.load %arg1[%116] : memref<64xi32, #tpu.memory_space<smem>>
    %c0_i32_50 = arith.constant 0 : i32
    %c63_i32_51 = arith.constant 63 : i32
    %118 = arith.maxsi %c0_i32_50, %117 : i32
    %119 = arith.minsi %c63_i32_51, %118 : i32
    %120 = arith.index_cast %119 : i32 to index
    %c0_52 = arith.constant 0 : index
    %121 = vector.load %arg2[%120, %c0_52] : memref<64x32xf32, #tpu.memory_space<vmem>>, vector<1x32xf32>
    %122 = arith.addf %114, %121 : vector<1x32xf32>
    %c6_i32_53 = arith.constant 6 : i32
    %123 = arith.addi %73, %c6_i32_53 : i32
    %124 = arith.index_cast %123 : i32 to index
    %125 = memref.load %arg1[%124] : memref<64xi32, #tpu.memory_space<smem>>
    %c0_i32_54 = arith.constant 0 : i32
    %c63_i32_55 = arith.constant 63 : i32
    %126 = arith.maxsi %c0_i32_54, %125 : i32
    %127 = arith.minsi %c63_i32_55, %126 : i32
    %128 = arith.index_cast %127 : i32 to index
    %c0_56 = arith.constant 0 : index
    %129 = vector.load %arg2[%128, %c0_56] : memref<64x32xf32, #tpu.memory_space<vmem>>, vector<1x32xf32>
    %130 = arith.addf %122, %129 : vector<1x32xf32>
    %c7_i32_57 = arith.constant 7 : i32
    %131 = arith.addi %73, %c7_i32_57 : i32
    %132 = arith.index_cast %131 : i32 to index
    %133 = memref.load %arg1[%132] : memref<64xi32, #tpu.memory_space<smem>>
    %c0_i32_58 = arith.constant 0 : i32
    %c63_i32_59 = arith.constant 63 : i32
    %134 = arith.maxsi %c0_i32_58, %133 : i32
    %135 = arith.minsi %c63_i32_59, %134 : i32
    %136 = arith.index_cast %135 : i32 to index
    %c0_60 = arith.constant 0 : index
    %137 = vector.load %arg2[%136, %c0_60] : memref<64x32xf32, #tpu.memory_space<vmem>>, vector<1x32xf32>
    %138 = arith.addf %130, %137 : vector<1x32xf32>
    %cst_61 = arith.constant 1.250000e-01 : f32
    %139 = vector.broadcast %cst_61 : f32 to vector<1x32xf32>
    %140 = arith.mulf %138, %139 : vector<1x32xf32>
    %141 = arith.index_cast %c1_i32_26 : i32 to index
    %c0_62 = arith.constant 0 : index
    %142 = vector.load %arg8[%141, %c0_62] : memref<8x32xf32, #tpu.memory_space<vmem>>, vector<1x32xf32>
    tpu.vector_store %arg8[%141, %c0_62], %140 {strides = array<i32>} : memref<8x32xf32, #tpu.memory_space<vmem>>, vector<1x32xf32>,
    %c2_i32_63 = arith.constant 2 : i32
    %143 = arith.addi %0, %c2_i32_63 : i32
    %c8_i32_64 = arith.constant 8 : i32
    %144 = arith.muli %143, %c8_i32_64 : i32
    %cst_65 = arith.constant 0.000000e+00 : f32
    %145 = vector.broadcast %cst_65 : f32 to vector<1x32xf32>
    %c0_i32_66 = arith.constant 0 : i32
    %146 = arith.addi %144, %c0_i32_66 : i32
    %147 = arith.index_cast %146 : i32 to index
    %148 = memref.load %arg1[%147] : memref<64xi32, #tpu.memory_space<smem>>
    %c0_i32_67 = arith.constant 0 : i32
    %c63_i32_68 = arith.constant 63 : i32
    %149 = arith.maxsi %c0_i32_67, %148 : i32
    %150 = arith.minsi %c63_i32_68, %149 : i32
    %151 = arith.index_cast %150 : i32 to index
    %c0_69 = arith.constant 0 : index
    %152 = vector.load %arg2[%151, %c0_69] : memref<64x32xf32, #tpu.memory_space<vmem>>, vector<1x32xf32>
    %153 = arith.addf %145, %152 : vector<1x32xf32>
    %c1_i32_70 = arith.constant 1 : i32
    %154 = arith.addi %144, %c1_i32_70 : i32
    %155 = arith.index_cast %154 : i32 to index
    %156 = memref.load %arg1[%155] : memref<64xi32, #tpu.memory_space<smem>>
    %c0_i32_71 = arith.constant 0 : i32
    %c63_i32_72 = arith.constant 63 : i32
    %157 = arith.maxsi %c0_i32_71, %156 : i32
    %158 = arith.minsi %c63_i32_72, %157 : i32
    %159 = arith.index_cast %158 : i32 to index
    %c0_73 = arith.constant 0 : index
    %160 = vector.load %arg2[%159, %c0_73] : memref<64x32xf32, #tpu.memory_space<vmem>>, vector<1x32xf32>
    %161 = arith.addf %153, %160 : vector<1x32xf32>
    %c2_i32_74 = arith.constant 2 : i32
    %162 = arith.addi %144, %c2_i32_74 : i32
    %163 = arith.index_cast %162 : i32 to index
    %164 = memref.load %arg1[%163] : memref<64xi32, #tpu.memory_space<smem>>
    %c0_i32_75 = arith.constant 0 : i32
    %c63_i32_76 = arith.constant 63 : i32
    %165 = arith.maxsi %c0_i32_75, %164 : i32
    %166 = arith.minsi %c63_i32_76, %165 : i32
    %167 = arith.index_cast %166 : i32 to index
    %c0_77 = arith.constant 0 : index
    %168 = vector.load %arg2[%167, %c0_77] : memref<64x32xf32, #tpu.memory_space<vmem>>, vector<1x32xf32>
    %169 = arith.addf %161, %168 : vector<1x32xf32>
    %c3_i32_78 = arith.constant 3 : i32
    %170 = arith.addi %144, %c3_i32_78 : i32
    %171 = arith.index_cast %170 : i32 to index
    %172 = memref.load %arg1[%171] : memref<64xi32, #tpu.memory_space<smem>>
    %c0_i32_79 = arith.constant 0 : i32
    %c63_i32_80 = arith.constant 63 : i32
    %173 = arith.maxsi %c0_i32_79, %172 : i32
    %174 = arith.minsi %c63_i32_80, %173 : i32
    %175 = arith.index_cast %174 : i32 to index
    %c0_81 = arith.constant 0 : index
    %176 = vector.load %arg2[%175, %c0_81] : memref<64x32xf32, #tpu.memory_space<vmem>>, vector<1x32xf32>
    %177 = arith.addf %169, %176 : vector<1x32xf32>
    %c4_i32_82 = arith.constant 4 : i32
    %178 = arith.addi %144, %c4_i32_82 : i32
    %179 = arith.index_cast %178 : i32 to index
    %180 = memref.load %arg1[%179] : memref<64xi32, #tpu.memory_space<smem>>
    %c0_i32_83 = arith.constant 0 : i32
    %c63_i32_84 = arith.constant 63 : i32
    %181 = arith.maxsi %c0_i32_83, %180 : i32
    %182 = arith.minsi %c63_i32_84, %181 : i32
    %183 = arith.index_cast %182 : i32 to index
    %c0_85 = arith.constant 0 : index
    %184 = vector.load %arg2[%183, %c0_85] : memref<64x32xf32, #tpu.memory_space<vmem>>, vector<1x32xf32>
    %185 = arith.addf %177, %184 : vector<1x32xf32>
    %c5_i32_86 = arith.constant 5 : i32
    %186 = arith.addi %144, %c5_i32_86 : i32
    %187 = arith.index_cast %186 : i32 to index
    %188 = memref.load %arg1[%187] : memref<64xi32, #tpu.memory_space<smem>>
    %c0_i32_87 = arith.constant 0 : i32
    %c63_i32_88 = arith.constant 63 : i32
    %189 = arith.maxsi %c0_i32_87, %188 : i32
    %190 = arith.minsi %c63_i32_88, %189 : i32
    %191 = arith.index_cast %190 : i32 to index
    %c0_89 = arith.constant 0 : index
    %192 = vector.load %arg2[%191, %c0_89] : memref<64x32xf32, #tpu.memory_space<vmem>>, vector<1x32xf32>
    %193 = arith.addf %185, %192 : vector<1x32xf32>
    %c6_i32_90 = arith.constant 6 : i32
    %194 = arith.addi %144, %c6_i32_90 : i32
    %195 = arith.index_cast %194 : i32 to index
    %196 = memref.load %arg1[%195] : memref<64xi32, #tpu.memory_space<smem>>
    %c0_i32_91 = arith.constant 0 : i32
    %c63_i32_92 = arith.constant 63 : i32
    %197 = arith.maxsi %c0_i32_91, %196 : i32
    %198 = arith.minsi %c63_i32_92, %197 : i32
    %199 = arith.index_cast %198 : i32 to index
    %c0_93 = arith.constant 0 : index
    %200 = vector.load %arg2[%199, %c0_93] : memref<64x32xf32, #tpu.memory_space<vmem>>, vector<1x32xf32>
    %201 = arith.addf %193, %200 : vector<1x32xf32>
    %c7_i32_94 = arith.constant 7 : i32
    %202 = arith.addi %144, %c7_i32_94 : i32
    %203 = arith.index_cast %202 : i32 to index
    %204 = memref.load %arg1[%203] : memref<64xi32, #tpu.memory_space<smem>>
    %c0_i32_95 = arith.constant 0 : i32
    %c63_i32_96 = arith.constant 63 : i32
    %205 = arith.maxsi %c0_i32_95, %204 : i32
    %206 = arith.minsi %c63_i32_96, %205 : i32
    %207 = arith.index_cast %206 : i32 to index
    %c0_97 = arith.constant 0 : index
    %208 = vector.load %arg2[%207, %c0_97] : memref<64x32xf32, #tpu.memory_space<vmem>>, vector<1x32xf32>
    %209 = arith.addf %201, %208 : vector<1x32xf32>
    %cst_98 = arith.constant 1.250000e-01 : f32
    %210 = vector.broadcast %cst_98 : f32 to vector<1x32xf32>
    %211 = arith.mulf %209, %210 : vector<1x32xf32>
    %212 = arith.index_cast %c2_i32_63 : i32 to index
    %c0_99 = arith.constant 0 : index
    %213 = vector.load %arg8[%212, %c0_99] : memref<8x32xf32, #tpu.memory_space<vmem>>, vector<1x32xf32>
    tpu.vector_store %arg8[%212, %c0_99], %211 {strides = array<i32>} : memref<8x32xf32, #tpu.memory_space<vmem>>, vector<1x32xf32>,
    %c3_i32_100 = arith.constant 3 : i32
    %214 = arith.addi %0, %c3_i32_100 : i32
    %c8_i32_101 = arith.constant 8 : i32
    %215 = arith.muli %214, %c8_i32_101 : i32
    %cst_102 = arith.constant 0.000000e+00 : f32
    %216 = vector.broadcast %cst_102 : f32 to vector<1x32xf32>
    %c0_i32_103 = arith.constant 0 : i32
    %217 = arith.addi %215, %c0_i32_103 : i32
    %218 = arith.index_cast %217 : i32 to index
    %219 = memref.load %arg1[%218] : memref<64xi32, #tpu.memory_space<smem>>
    %c0_i32_104 = arith.constant 0 : i32
    %c63_i32_105 = arith.constant 63 : i32
    %220 = arith.maxsi %c0_i32_104, %219 : i32
    %221 = arith.minsi %c63_i32_105, %220 : i32
    %222 = arith.index_cast %221 : i32 to index
    %c0_106 = arith.constant 0 : index
    %223 = vector.load %arg2[%222, %c0_106] : memref<64x32xf32, #tpu.memory_space<vmem>>, vector<1x32xf32>
    %224 = arith.addf %216, %223 : vector<1x32xf32>
    %c1_i32_107 = arith.constant 1 : i32
    %225 = arith.addi %215, %c1_i32_107 : i32
    %226 = arith.index_cast %225 : i32 to index
    %227 = memref.load %arg1[%226] : memref<64xi32, #tpu.memory_space<smem>>
    %c0_i32_108 = arith.constant 0 : i32
    %c63_i32_109 = arith.constant 63 : i32
    %228 = arith.maxsi %c0_i32_108, %227 : i32
    %229 = arith.minsi %c63_i32_109, %228 : i32
    %230 = arith.index_cast %229 : i32 to index
    %c0_110 = arith.constant 0 : index
    %231 = vector.load %arg2[%230, %c0_110] : memref<64x32xf32, #tpu.memory_space<vmem>>, vector<1x32xf32>
    %232 = arith.addf %224, %231 : vector<1x32xf32>
    %c2_i32_111 = arith.constant 2 : i32
    %233 = arith.addi %215, %c2_i32_111 : i32
    %234 = arith.index_cast %233 : i32 to index
    %235 = memref.load %arg1[%234] : memref<64xi32, #tpu.memory_space<smem>>
    %c0_i32_112 = arith.constant 0 : i32
    %c63_i32_113 = arith.constant 63 : i32
    %236 = arith.maxsi %c0_i32_112, %235 : i32
    %237 = arith.minsi %c63_i32_113, %236 : i32
    %238 = arith.index_cast %237 : i32 to index
    %c0_114 = arith.constant 0 : index
    %239 = vector.load %arg2[%238, %c0_114] : memref<64x32xf32, #tpu.memory_space<vmem>>, vector<1x32xf32>
    %240 = arith.addf %232, %239 : vector<1x32xf32>
    %c3_i32_115 = arith.constant 3 : i32
    %241 = arith.addi %215, %c3_i32_115 : i32
    %242 = arith.index_cast %241 : i32 to index
    %243 = memref.load %arg1[%242] : memref<64xi32, #tpu.memory_space<smem>>
    %c0_i32_116 = arith.constant 0 : i32
    %c63_i32_117 = arith.constant 63 : i32
    %244 = arith.maxsi %c0_i32_116, %243 : i32
    %245 = arith.minsi %c63_i32_117, %244 : i32
    %246 = arith.index_cast %245 : i32 to index
    %c0_118 = arith.constant 0 : index
    %247 = vector.load %arg2[%246, %c0_118] : memref<64x32xf32, #tpu.memory_space<vmem>>, vector<1x32xf32>
    %248 = arith.addf %240, %247 : vector<1x32xf32>
    %c4_i32_119 = arith.constant 4 : i32
    %249 = arith.addi %215, %c4_i32_119 : i32
    %250 = arith.index_cast %249 : i32 to index
    %251 = memref.load %arg1[%250] : memref<64xi32, #tpu.memory_space<smem>>
    %c0_i32_120 = arith.constant 0 : i32
    %c63_i32_121 = arith.constant 63 : i32
    %252 = arith.maxsi %c0_i32_120, %251 : i32
    %253 = arith.minsi %c63_i32_121, %252 : i32
    %254 = arith.index_cast %253 : i32 to index
    %c0_122 = arith.constant 0 : index
    %255 = vector.load %arg2[%254, %c0_122] : memref<64x32xf32, #tpu.memory_space<vmem>>, vector<1x32xf32>
    %256 = arith.addf %248, %255 : vector<1x32xf32>
    %c5_i32_123 = arith.constant 5 : i32
    %257 = arith.addi %215, %c5_i32_123 : i32
    %258 = arith.index_cast %257 : i32 to index
    %259 = memref.load %arg1[%258] : memref<64xi32, #tpu.memory_space<smem>>
    %c0_i32_124 = arith.constant 0 : i32
    %c63_i32_125 = arith.constant 63 : i32
    %260 = arith.maxsi %c0_i32_124, %259 : i32
    %261 = arith.minsi %c63_i32_125, %260 : i32
    %262 = arith.index_cast %261 : i32 to index
    %c0_126 = arith.constant 0 : index
    %263 = vector.load %arg2[%262, %c0_126] : memref<64x32xf32, #tpu.memory_space<vmem>>, vector<1x32xf32>
    %264 = arith.addf %256, %263 : vector<1x32xf32>
    %c6_i32_127 = arith.constant 6 : i32
    %265 = arith.addi %215, %c6_i32_127 : i32
    %266 = arith.index_cast %265 : i32 to index
    %267 = memref.load %arg1[%266] : memref<64xi32, #tpu.memory_space<smem>>
    %c0_i32_128 = arith.constant 0 : i32
    %c63_i32_129 = arith.constant 63 : i32
    %268 = arith.maxsi %c0_i32_128, %267 : i32
    %269 = arith.minsi %c63_i32_129, %268 : i32
    %270 = arith.index_cast %269 : i32 to index
    %c0_130 = arith.constant 0 : index
    %271 = vector.load %arg2[%270, %c0_130] : memref<64x32xf32, #tpu.memory_space<vmem>>, vector<1x32xf32>
    %272 = arith.addf %264, %271 : vector<1x32xf32>
    %c7_i32_131 = arith.constant 7 : i32
    %273 = arith.addi %215, %c7_i32_131 : i32
    %274 = arith.index_cast %273 : i32 to index
    %275 = memref.load %arg1[%274] : memref<64xi32, #tpu.memory_space<smem>>
    %c0_i32_132 = arith.constant 0 : i32
    %c63_i32_133 = arith.constant 63 : i32
    %276 = arith.maxsi %c0_i32_132, %275 : i32
    %277 = arith.minsi %c63_i32_133, %276 : i32
    %278 = arith.index_cast %277 : i32 to index
    %c0_134 = arith.constant 0 : index
    %279 = vector.load %arg2[%278, %c0_134] : memref<64x32xf32, #tpu.memory_space<vmem>>, vector<1x32xf32>
    %280 = arith.addf %272, %279 : vector<1x32xf32>
    %cst_135 = arith.constant 1.250000e-01 : f32
    %281 = vector.broadcast %cst_135 : f32 to vector<1x32xf32>
    %282 = arith.mulf %280, %281 : vector<1x32xf32>
    %283 = arith.index_cast %c3_i32_100 : i32 to index
    %c0_136 = arith.constant 0 : index
    %284 = vector.load %arg8[%283, %c0_136] : memref<8x32xf32, #tpu.memory_space<vmem>>, vector<1x32xf32>
    tpu.vector_store %arg8[%283, %c0_136], %282 {strides = array<i32>} : memref<8x32xf32, #tpu.memory_space<vmem>>, vector<1x32xf32>,
    %c4_i32_137 = arith.constant 4 : i32
    %285 = arith.addi %0, %c4_i32_137 : i32
    %c8_i32_138 = arith.constant 8 : i32
    %286 = arith.muli %285, %c8_i32_138 : i32
    %cst_139 = arith.constant 0.000000e+00 : f32
    %287 = vector.broadcast %cst_139 : f32 to vector<1x32xf32>
    %c0_i32_140 = arith.constant 0 : i32
    %288 = arith.addi %286, %c0_i32_140 : i32
    %289 = arith.index_cast %288 : i32 to index
    %290 = memref.load %arg1[%289] : memref<64xi32, #tpu.memory_space<smem>>
    %c0_i32_141 = arith.constant 0 : i32
    %c63_i32_142 = arith.constant 63 : i32
    %291 = arith.maxsi %c0_i32_141, %290 : i32
    %292 = arith.minsi %c63_i32_142, %291 : i32
    %293 = arith.index_cast %292 : i32 to index
    %c0_143 = arith.constant 0 : index
    %294 = vector.load %arg2[%293, %c0_143] : memref<64x32xf32, #tpu.memory_space<vmem>>, vector<1x32xf32>
    %295 = arith.addf %287, %294 : vector<1x32xf32>
    %c1_i32_144 = arith.constant 1 : i32
    %296 = arith.addi %286, %c1_i32_144 : i32
    %297 = arith.index_cast %296 : i32 to index
    %298 = memref.load %arg1[%297] : memref<64xi32, #tpu.memory_space<smem>>
    %c0_i32_145 = arith.constant 0 : i32
    %c63_i32_146 = arith.constant 63 : i32
    %299 = arith.maxsi %c0_i32_145, %298 : i32
    %300 = arith.minsi %c63_i32_146, %299 : i32
    %301 = arith.index_cast %300 : i32 to index
    %c0_147 = arith.constant 0 : index
    %302 = vector.load %arg2[%301, %c0_147] : memref<64x32xf32, #tpu.memory_space<vmem>>, vector<1x32xf32>
    %303 = arith.addf %295, %302 : vector<1x32xf32>
    %c2_i32_148 = arith.constant 2 : i32
    %304 = arith.addi %286, %c2_i32_148 : i32
    %305 = arith.index_cast %304 : i32 to index
    %306 = memref.load %arg1[%305] : memref<64xi32, #tpu.memory_space<smem>>
    %c0_i32_149 = arith.constant 0 : i32
    %c63_i32_150 = arith.constant 63 : i32
    %307 = arith.maxsi %c0_i32_149, %306 : i32
    %308 = arith.minsi %c63_i32_150, %307 : i32
    %309 = arith.index_cast %308 : i32 to index
    %c0_151 = arith.constant 0 : index
    %310 = vector.load %arg2[%309, %c0_151] : memref<64x32xf32, #tpu.memory_space<vmem>>, vector<1x32xf32>
    %311 = arith.addf %303, %310 : vector<1x32xf32>
    %c3_i32_152 = arith.constant 3 : i32
    %312 = arith.addi %286, %c3_i32_152 : i32
    %313 = arith.index_cast %312 : i32 to index
    %314 = memref.load %arg1[%313] : memref<64xi32, #tpu.memory_space<smem>>
    %c0_i32_153 = arith.constant 0 : i32
    %c63_i32_154 = arith.constant 63 : i32
    %315 = arith.maxsi %c0_i32_153, %314 : i32
    %316 = arith.minsi %c63_i32_154, %315 : i32
    %317 = arith.index_cast %316 : i32 to index
    %c0_155 = arith.constant 0 : index
    %318 = vector.load %arg2[%317, %c0_155] : memref<64x32xf32, #tpu.memory_space<vmem>>, vector<1x32xf32>
    %319 = arith.addf %311, %318 : vector<1x32xf32>
    %c4_i32_156 = arith.constant 4 : i32
    %320 = arith.addi %286, %c4_i32_156 : i32
    %321 = arith.index_cast %320 : i32 to index
    %322 = memref.load %arg1[%321] : memref<64xi32, #tpu.memory_space<smem>>
    %c0_i32_157 = arith.constant 0 : i32
    %c63_i32_158 = arith.constant 63 : i32
    %323 = arith.maxsi %c0_i32_157, %322 : i32
    %324 = arith.minsi %c63_i32_158, %323 : i32
    %325 = arith.index_cast %324 : i32 to index
    %c0_159 = arith.constant 0 : index
    %326 = vector.load %arg2[%325, %c0_159] : memref<64x32xf32, #tpu.memory_space<vmem>>, vector<1x32xf32>
    %327 = arith.addf %319, %326 : vector<1x32xf32>
    %c5_i32_160 = arith.constant 5 : i32
    %328 = arith.addi %286, %c5_i32_160 : i32
    %329 = arith.index_cast %328 : i32 to index
    %330 = memref.load %arg1[%329] : memref<64xi32, #tpu.memory_space<smem>>
    %c0_i32_161 = arith.constant 0 : i32
    %c63_i32_162 = arith.constant 63 : i32
    %331 = arith.maxsi %c0_i32_161, %330 : i32
    %332 = arith.minsi %c63_i32_162, %331 : i32
    %333 = arith.index_cast %332 : i32 to index
    %c0_163 = arith.constant 0 : index
    %334 = vector.load %arg2[%333, %c0_163] : memref<64x32xf32, #tpu.memory_space<vmem>>, vector<1x32xf32>
    %335 = arith.addf %327, %334 : vector<1x32xf32>
    %c6_i32_164 = arith.constant 6 : i32
    %336 = arith.addi %286, %c6_i32_164 : i32
    %337 = arith.index_cast %336 : i32 to index
    %338 = memref.load %arg1[%337] : memref<64xi32, #tpu.memory_space<smem>>
    %c0_i32_165 = arith.constant 0 : i32
    %c63_i32_166 = arith.constant 63 : i32
    %339 = arith.maxsi %c0_i32_165, %338 : i32
    %340 = arith.minsi %c63_i32_166, %339 : i32
    %341 = arith.index_cast %340 : i32 to index
    %c0_167 = arith.constant 0 : index
    %342 = vector.load %arg2[%341, %c0_167] : memref<64x32xf32, #tpu.memory_space<vmem>>, vector<1x32xf32>
    %343 = arith.addf %335, %342 : vector<1x32xf32>
    %c7_i32_168 = arith.constant 7 : i32
    %344 = arith.addi %286, %c7_i32_168 : i32
    %345 = arith.index_cast %344 : i32 to index
    %346 = memref.load %arg1[%345] : memref<64xi32, #tpu.memory_space<smem>>
    %c0_i32_169 = arith.constant 0 : i32
    %c63_i32_170 = arith.constant 63 : i32
    %347 = arith.maxsi %c0_i32_169, %346 : i32
    %348 = arith.minsi %c63_i32_170, %347 : i32
    %349 = arith.index_cast %348 : i32 to index
    %c0_171 = arith.constant 0 : index
    %350 = vector.load %arg2[%349, %c0_171] : memref<64x32xf32, #tpu.memory_space<vmem>>, vector<1x32xf32>
    %351 = arith.addf %343, %350 : vector<1x32xf32>
    %cst_172 = arith.constant 1.250000e-01 : f32
    %352 = vector.broadcast %cst_172 : f32 to vector<1x32xf32>
    %353 = arith.mulf %351, %352 : vector<1x32xf32>
    %354 = arith.index_cast %c4_i32_137 : i32 to index
    %c0_173 = arith.constant 0 : index
    %355 = vector.load %arg8[%354, %c0_173] : memref<8x32xf32, #tpu.memory_space<vmem>>, vector<1x32xf32>
    tpu.vector_store %arg8[%354, %c0_173], %353 {strides = array<i32>} : memref<8x32xf32, #tpu.memory_space<vmem>>, vector<1x32xf32>,
    %c5_i32_174 = arith.constant 5 : i32
    %356 = arith.addi %0, %c5_i32_174 : i32
    %c8_i32_175 = arith.constant 8 : i32
    %357 = arith.muli %356, %c8_i32_175 : i32
    %cst_176 = arith.constant 0.000000e+00 : f32
    %358 = vector.broadcast %cst_176 : f32 to vector<1x32xf32>
    %c0_i32_177 = arith.constant 0 : i32
    %359 = arith.addi %357, %c0_i32_177 : i32
    %360 = arith.index_cast %359 : i32 to index
    %361 = memref.load %arg1[%360] : memref<64xi32, #tpu.memory_space<smem>>
    %c0_i32_178 = arith.constant 0 : i32
    %c63_i32_179 = arith.constant 63 : i32
    %362 = arith.maxsi %c0_i32_178, %361 : i32
    %363 = arith.minsi %c63_i32_179, %362 : i32
    %364 = arith.index_cast %363 : i32 to index
    %c0_180 = arith.constant 0 : index
    %365 = vector.load %arg2[%364, %c0_180] : memref<64x32xf32, #tpu.memory_space<vmem>>, vector<1x32xf32>
    %366 = arith.addf %358, %365 : vector<1x32xf32>
    %c1_i32_181 = arith.constant 1 : i32
    %367 = arith.addi %357, %c1_i32_181 : i32
    %368 = arith.index_cast %367 : i32 to index
    %369 = memref.load %arg1[%368] : memref<64xi32, #tpu.memory_space<smem>>
    %c0_i32_182 = arith.constant 0 : i32
    %c63_i32_183 = arith.constant 63 : i32
    %370 = arith.maxsi %c0_i32_182, %369 : i32
    %371 = arith.minsi %c63_i32_183, %370 : i32
    %372 = arith.index_cast %371 : i32 to index
    %c0_184 = arith.constant 0 : index
    %373 = vector.load %arg2[%372, %c0_184] : memref<64x32xf32, #tpu.memory_space<vmem>>, vector<1x32xf32>
    %374 = arith.addf %366, %373 : vector<1x32xf32>
    %c2_i32_185 = arith.constant 2 : i32
    %375 = arith.addi %357, %c2_i32_185 : i32
    %376 = arith.index_cast %375 : i32 to index
    %377 = memref.load %arg1[%376] : memref<64xi32, #tpu.memory_space<smem>>
    %c0_i32_186 = arith.constant 0 : i32
    %c63_i32_187 = arith.constant 63 : i32
    %378 = arith.maxsi %c0_i32_186, %377 : i32
    %379 = arith.minsi %c63_i32_187, %378 : i32
    %380 = arith.index_cast %379 : i32 to index
    %c0_188 = arith.constant 0 : index
    %381 = vector.load %arg2[%380, %c0_188] : memref<64x32xf32, #tpu.memory_space<vmem>>, vector<1x32xf32>
    %382 = arith.addf %374, %381 : vector<1x32xf32>
    %c3_i32_189 = arith.constant 3 : i32
    %383 = arith.addi %357, %c3_i32_189 : i32
    %384 = arith.index_cast %383 : i32 to index
    %385 = memref.load %arg1[%384] : memref<64xi32, #tpu.memory_space<smem>>
    %c0_i32_190 = arith.constant 0 : i32
    %c63_i32_191 = arith.constant 63 : i32
    %386 = arith.maxsi %c0_i32_190, %385 : i32
    %387 = arith.minsi %c63_i32_191, %386 : i32
    %388 = arith.index_cast %387 : i32 to index
    %c0_192 = arith.constant 0 : index
    %389 = vector.load %arg2[%388, %c0_192] : memref<64x32xf32, #tpu.memory_space<vmem>>, vector<1x32xf32>
    %390 = arith.addf %382, %389 : vector<1x32xf32>
    %c4_i32_193 = arith.constant 4 : i32
    %391 = arith.addi %357, %c4_i32_193 : i32
    %392 = arith.index_cast %391 : i32 to index
    %393 = memref.load %arg1[%392] : memref<64xi32, #tpu.memory_space<smem>>
    %c0_i32_194 = arith.constant 0 : i32
    %c63_i32_195 = arith.constant 63 : i32
    %394 = arith.maxsi %c0_i32_194, %393 : i32
    %395 = arith.minsi %c63_i32_195, %394 : i32
    %396 = arith.index_cast %395 : i32 to index
    %c0_196 = arith.constant 0 : index
    %397 = vector.load %arg2[%396, %c0_196] : memref<64x32xf32, #tpu.memory_space<vmem>>, vector<1x32xf32>
    %398 = arith.addf %390, %397 : vector<1x32xf32>
    %c5_i32_197 = arith.constant 5 : i32
    %399 = arith.addi %357, %c5_i32_197 : i32
    %400 = arith.index_cast %399 : i32 to index
    %401 = memref.load %arg1[%400] : memref<64xi32, #tpu.memory_space<smem>>
    %c0_i32_198 = arith.constant 0 : i32
    %c63_i32_199 = arith.constant 63 : i32
    %402 = arith.maxsi %c0_i32_198, %401 : i32
    %403 = arith.minsi %c63_i32_199, %402 : i32
    %404 = arith.index_cast %403 : i32 to index
    %c0_200 = arith.constant 0 : index
    %405 = vector.load %arg2[%404, %c0_200] : memref<64x32xf32, #tpu.memory_space<vmem>>, vector<1x32xf32>
    %406 = arith.addf %398, %405 : vector<1x32xf32>
    %c6_i32_201 = arith.constant 6 : i32
    %407 = arith.addi %357, %c6_i32_201 : i32
    %408 = arith.index_cast %407 : i32 to index
    %409 = memref.load %arg1[%408] : memref<64xi32, #tpu.memory_space<smem>>
    %c0_i32_202 = arith.constant 0 : i32
    %c63_i32_203 = arith.constant 63 : i32
    %410 = arith.maxsi %c0_i32_202, %409 : i32
    %411 = arith.minsi %c63_i32_203, %410 : i32
    %412 = arith.index_cast %411 : i32 to index
    %c0_204 = arith.constant 0 : index
    %413 = vector.load %arg2[%412, %c0_204] : memref<64x32xf32, #tpu.memory_space<vmem>>, vector<1x32xf32>
    %414 = arith.addf %406, %413 : vector<1x32xf32>
    %c7_i32_205 = arith.constant 7 : i32
    %415 = arith.addi %357, %c7_i32_205 : i32
    %416 = arith.index_cast %415 : i32 to index
    %417 = memref.load %arg1[%416] : memref<64xi32, #tpu.memory_space<smem>>
    %c0_i32_206 = arith.constant 0 : i32
    %c63_i32_207 = arith.constant 63 : i32
    %418 = arith.maxsi %c0_i32_206, %417 : i32
    %419 = arith.minsi %c63_i32_207, %418 : i32
    %420 = arith.index_cast %419 : i32 to index
    %c0_208 = arith.constant 0 : index
    %421 = vector.load %arg2[%420, %c0_208] : memref<64x32xf32, #tpu.memory_space<vmem>>, vector<1x32xf32>
    %422 = arith.addf %414, %421 : vector<1x32xf32>
    %cst_209 = arith.constant 1.250000e-01 : f32
    %423 = vector.broadcast %cst_209 : f32 to vector<1x32xf32>
    %424 = arith.mulf %422, %423 : vector<1x32xf32>
    %425 = arith.index_cast %c5_i32_174 : i32 to index
    %c0_210 = arith.constant 0 : index
    %426 = vector.load %arg8[%425, %c0_210] : memref<8x32xf32, #tpu.memory_space<vmem>>, vector<1x32xf32>
    tpu.vector_store %arg8[%425, %c0_210], %424 {strides = array<i32>} : memref<8x32xf32, #tpu.memory_space<vmem>>, vector<1x32xf32>,
    %c6_i32_211 = arith.constant 6 : i32
    %427 = arith.addi %0, %c6_i32_211 : i32
    %c8_i32_212 = arith.constant 8 : i32
    %428 = arith.muli %427, %c8_i32_212 : i32
    %cst_213 = arith.constant 0.000000e+00 : f32
    %429 = vector.broadcast %cst_213 : f32 to vector<1x32xf32>
    %c0_i32_214 = arith.constant 0 : i32
    %430 = arith.addi %428, %c0_i32_214 : i32
    %431 = arith.index_cast %430 : i32 to index
    %432 = memref.load %arg1[%431] : memref<64xi32, #tpu.memory_space<smem>>
    %c0_i32_215 = arith.constant 0 : i32
    %c63_i32_216 = arith.constant 63 : i32
    %433 = arith.maxsi %c0_i32_215, %432 : i32
    %434 = arith.minsi %c63_i32_216, %433 : i32
    %435 = arith.index_cast %434 : i32 to index
    %c0_217 = arith.constant 0 : index
    %436 = vector.load %arg2[%435, %c0_217] : memref<64x32xf32, #tpu.memory_space<vmem>>, vector<1x32xf32>
    %437 = arith.addf %429, %436 : vector<1x32xf32>
    %c1_i32_218 = arith.constant 1 : i32
    %438 = arith.addi %428, %c1_i32_218 : i32
    %439 = arith.index_cast %438 : i32 to index
    %440 = memref.load %arg1[%439] : memref<64xi32, #tpu.memory_space<smem>>
    %c0_i32_219 = arith.constant 0 : i32
    %c63_i32_220 = arith.constant 63 : i32
    %441 = arith.maxsi %c0_i32_219, %440 : i32
    %442 = arith.minsi %c63_i32_220, %441 : i32
    %443 = arith.index_cast %442 : i32 to index
    %c0_221 = arith.constant 0 : index
    %444 = vector.load %arg2[%443, %c0_221] : memref<64x32xf32, #tpu.memory_space<vmem>>, vector<1x32xf32>
    %445 = arith.addf %437, %444 : vector<1x32xf32>
    %c2_i32_222 = arith.constant 2 : i32
    %446 = arith.addi %428, %c2_i32_222 : i32
    %447 = arith.index_cast %446 : i32 to index
    %448 = memref.load %arg1[%447] : memref<64xi32, #tpu.memory_space<smem>>
    %c0_i32_223 = arith.constant 0 : i32
    %c63_i32_224 = arith.constant 63 : i32
    %449 = arith.maxsi %c0_i32_223, %448 : i32
    %450 = arith.minsi %c63_i32_224, %449 : i32
    %451 = arith.index_cast %450 : i32 to index
    %c0_225 = arith.constant 0 : index
    %452 = vector.load %arg2[%451, %c0_225] : memref<64x32xf32, #tpu.memory_space<vmem>>, vector<1x32xf32>
    %453 = arith.addf %445, %452 : vector<1x32xf32>
    %c3_i32_226 = arith.constant 3 : i32
    %454 = arith.addi %428, %c3_i32_226 : i32
    %455 = arith.index_cast %454 : i32 to index
    %456 = memref.load %arg1[%455] : memref<64xi32, #tpu.memory_space<smem>>
    %c0_i32_227 = arith.constant 0 : i32
    %c63_i32_228 = arith.constant 63 : i32
    %457 = arith.maxsi %c0_i32_227, %456 : i32
    %458 = arith.minsi %c63_i32_228, %457 : i32
    %459 = arith.index_cast %458 : i32 to index
    %c0_229 = arith.constant 0 : index
    %460 = vector.load %arg2[%459, %c0_229] : memref<64x32xf32, #tpu.memory_space<vmem>>, vector<1x32xf32>
    %461 = arith.addf %453, %460 : vector<1x32xf32>
    %c4_i32_230 = arith.constant 4 : i32
    %462 = arith.addi %428, %c4_i32_230 : i32
    %463 = arith.index_cast %462 : i32 to index
    %464 = memref.load %arg1[%463] : memref<64xi32, #tpu.memory_space<smem>>
    %c0_i32_231 = arith.constant 0 : i32
    %c63_i32_232 = arith.constant 63 : i32
    %465 = arith.maxsi %c0_i32_231, %464 : i32
    %466 = arith.minsi %c63_i32_232, %465 : i32
    %467 = arith.index_cast %466 : i32 to index
    %c0_233 = arith.constant 0 : index
    %468 = vector.load %arg2[%467, %c0_233] : memref<64x32xf32, #tpu.memory_space<vmem>>, vector<1x32xf32>
    %469 = arith.addf %461, %468 : vector<1x32xf32>
    %c5_i32_234 = arith.constant 5 : i32
    %470 = arith.addi %428, %c5_i32_234 : i32
    %471 = arith.index_cast %470 : i32 to index
    %472 = memref.load %arg1[%471] : memref<64xi32, #tpu.memory_space<smem>>
    %c0_i32_235 = arith.constant 0 : i32
    %c63_i32_236 = arith.constant 63 : i32
    %473 = arith.maxsi %c0_i32_235, %472 : i32
    %474 = arith.minsi %c63_i32_236, %473 : i32
    %475 = arith.index_cast %474 : i32 to index
    %c0_237 = arith.constant 0 : index
    %476 = vector.load %arg2[%475, %c0_237] : memref<64x32xf32, #tpu.memory_space<vmem>>, vector<1x32xf32>
    %477 = arith.addf %469, %476 : vector<1x32xf32>
    %c6_i32_238 = arith.constant 6 : i32
    %478 = arith.addi %428, %c6_i32_238 : i32
    %479 = arith.index_cast %478 : i32 to index
    %480 = memref.load %arg1[%479] : memref<64xi32, #tpu.memory_space<smem>>
    %c0_i32_239 = arith.constant 0 : i32
    %c63_i32_240 = arith.constant 63 : i32
    %481 = arith.maxsi %c0_i32_239, %480 : i32
    %482 = arith.minsi %c63_i32_240, %481 : i32
    %483 = arith.index_cast %482 : i32 to index
    %c0_241 = arith.constant 0 : index
    %484 = vector.load %arg2[%483, %c0_241] : memref<64x32xf32, #tpu.memory_space<vmem>>, vector<1x32xf32>
    %485 = arith.addf %477, %484 : vector<1x32xf32>
    %c7_i32_242 = arith.constant 7 : i32
    %486 = arith.addi %428, %c7_i32_242 : i32
    %487 = arith.index_cast %486 : i32 to index
    %488 = memref.load %arg1[%487] : memref<64xi32, #tpu.memory_space<smem>>
    %c0_i32_243 = arith.constant 0 : i32
    %c63_i32_244 = arith.constant 63 : i32
    %489 = arith.maxsi %c0_i32_243, %488 : i32
    %490 = arith.minsi %c63_i32_244, %489 : i32
    %491 = arith.index_cast %490 : i32 to index
    %c0_245 = arith.constant 0 : index
    %492 = vector.load %arg2[%491, %c0_245] : memref<64x32xf32, #tpu.memory_space<vmem>>, vector<1x32xf32>
    %493 = arith.addf %485, %492 : vector<1x32xf32>
    %cst_246 = arith.constant 1.250000e-01 : f32
    %494 = vector.broadcast %cst_246 : f32 to vector<1x32xf32>
    %495 = arith.mulf %493, %494 : vector<1x32xf32>
    %496 = arith.index_cast %c6_i32_211 : i32 to index
    %c0_247 = arith.constant 0 : index
    %497 = vector.load %arg8[%496, %c0_247] : memref<8x32xf32, #tpu.memory_space<vmem>>, vector<1x32xf32>
    tpu.vector_store %arg8[%496, %c0_247], %495 {strides = array<i32>} : memref<8x32xf32, #tpu.memory_space<vmem>>, vector<1x32xf32>,
    %c7_i32_248 = arith.constant 7 : i32
    %498 = arith.addi %0, %c7_i32_248 : i32
    %c8_i32_249 = arith.constant 8 : i32
    %499 = arith.muli %498, %c8_i32_249 : i32
    %cst_250 = arith.constant 0.000000e+00 : f32
    %500 = vector.broadcast %cst_250 : f32 to vector<1x32xf32>
    %c0_i32_251 = arith.constant 0 : i32
    %501 = arith.addi %499, %c0_i32_251 : i32
    %502 = arith.index_cast %501 : i32 to index
    %503 = memref.load %arg1[%502] : memref<64xi32, #tpu.memory_space<smem>>
    %c0_i32_252 = arith.constant 0 : i32
    %c63_i32_253 = arith.constant 63 : i32
    %504 = arith.maxsi %c0_i32_252, %503 : i32
    %505 = arith.minsi %c63_i32_253, %504 : i32
    %506 = arith.index_cast %505 : i32 to index
    %c0_254 = arith.constant 0 : index
    %507 = vector.load %arg2[%506, %c0_254] : memref<64x32xf32, #tpu.memory_space<vmem>>, vector<1x32xf32>
    %508 = arith.addf %500, %507 : vector<1x32xf32>
    %c1_i32_255 = arith.constant 1 : i32
    %509 = arith.addi %499, %c1_i32_255 : i32
    %510 = arith.index_cast %509 : i32 to index
    %511 = memref.load %arg1[%510] : memref<64xi32, #tpu.memory_space<smem>>
    %c0_i32_256 = arith.constant 0 : i32
    %c63_i32_257 = arith.constant 63 : i32
    %512 = arith.maxsi %c0_i32_256, %511 : i32
    %513 = arith.minsi %c63_i32_257, %512 : i32
    %514 = arith.index_cast %513 : i32 to index
    %c0_258 = arith.constant 0 : index
    %515 = vector.load %arg2[%514, %c0_258] : memref<64x32xf32, #tpu.memory_space<vmem>>, vector<1x32xf32>
    %516 = arith.addf %508, %515 : vector<1x32xf32>
    %c2_i32_259 = arith.constant 2 : i32
    %517 = arith.addi %499, %c2_i32_259 : i32
    %518 = arith.index_cast %517 : i32 to index
    %519 = memref.load %arg1[%518] : memref<64xi32, #tpu.memory_space<smem>>
    %c0_i32_260 = arith.constant 0 : i32
    %c63_i32_261 = arith.constant 63 : i32
    %520 = arith.maxsi %c0_i32_260, %519 : i32
    %521 = arith.minsi %c63_i32_261, %520 : i32
    %522 = arith.index_cast %521 : i32 to index
    %c0_262 = arith.constant 0 : index
    %523 = vector.load %arg2[%522, %c0_262] : memref<64x32xf32, #tpu.memory_space<vmem>>, vector<1x32xf32>
    %524 = arith.addf %516, %523 : vector<1x32xf32>
    %c3_i32_263 = arith.constant 3 : i32
    %525 = arith.addi %499, %c3_i32_263 : i32
    %526 = arith.index_cast %525 : i32 to index
    %527 = memref.load %arg1[%526] : memref<64xi32, #tpu.memory_space<smem>>
    %c0_i32_264 = arith.constant 0 : i32
    %c63_i32_265 = arith.constant 63 : i32
    %528 = arith.maxsi %c0_i32_264, %527 : i32
    %529 = arith.minsi %c63_i32_265, %528 : i32
    %530 = arith.index_cast %529 : i32 to index
    %c0_266 = arith.constant 0 : index
    %531 = vector.load %arg2[%530, %c0_266] : memref<64x32xf32, #tpu.memory_space<vmem>>, vector<1x32xf32>
    %532 = arith.addf %524, %531 : vector<1x32xf32>
    %c4_i32_267 = arith.constant 4 : i32
    %533 = arith.addi %499, %c4_i32_267 : i32
    %534 = arith.index_cast %533 : i32 to index
    %535 = memref.load %arg1[%534] : memref<64xi32, #tpu.memory_space<smem>>
    %c0_i32_268 = arith.constant 0 : i32
    %c63_i32_269 = arith.constant 63 : i32
    %536 = arith.maxsi %c0_i32_268, %535 : i32
    %537 = arith.minsi %c63_i32_269, %536 : i32
    %538 = arith.index_cast %537 : i32 to index
    %c0_270 = arith.constant 0 : index
    %539 = vector.load %arg2[%538, %c0_270] : memref<64x32xf32, #tpu.memory_space<vmem>>, vector<1x32xf32>
    %540 = arith.addf %532, %539 : vector<1x32xf32>
    %c5_i32_271 = arith.constant 5 : i32
    %541 = arith.addi %499, %c5_i32_271 : i32
    %542 = arith.index_cast %541 : i32 to index
    %543 = memref.load %arg1[%542] : memref<64xi32, #tpu.memory_space<smem>>
    %c0_i32_272 = arith.constant 0 : i32
    %c63_i32_273 = arith.constant 63 : i32
    %544 = arith.maxsi %c0_i32_272, %543 : i32
    %545 = arith.minsi %c63_i32_273, %544 : i32
    %546 = arith.index_cast %545 : i32 to index
    %c0_274 = arith.constant 0 : index
    %547 = vector.load %arg2[%546, %c0_274] : memref<64x32xf32, #tpu.memory_space<vmem>>, vector<1x32xf32>
    %548 = arith.addf %540, %547 : vector<1x32xf32>
    %c6_i32_275 = arith.constant 6 : i32
    %549 = arith.addi %499, %c6_i32_275 : i32
    %550 = arith.index_cast %549 : i32 to index
    %551 = memref.load %arg1[%550] : memref<64xi32, #tpu.memory_space<smem>>
    %c0_i32_276 = arith.constant 0 : i32
    %c63_i32_277 = arith.constant 63 : i32
    %552 = arith.maxsi %c0_i32_276, %551 : i32
    %553 = arith.minsi %c63_i32_277, %552 : i32
    %554 = arith.index_cast %553 : i32 to index
    %c0_278 = arith.constant 0 : index
    %555 = vector.load %arg2[%554, %c0_278] : memref<64x32xf32, #tpu.memory_space<vmem>>, vector<1x32xf32>
    %556 = arith.addf %548, %555 : vector<1x32xf32>
    %c7_i32_279 = arith.constant 7 : i32
    %557 = arith.addi %499, %c7_i32_279 : i32
    %558 = arith.index_cast %557 : i32 to index
    %559 = memref.load %arg1[%558] : memref<64xi32, #tpu.memory_space<smem>>
    %c0_i32_280 = arith.constant 0 : i32
    %c63_i32_281 = arith.constant 63 : i32
    %560 = arith.maxsi %c0_i32_280, %559 : i32
    %561 = arith.minsi %c63_i32_281, %560 : i32
    %562 = arith.index_cast %561 : i32 to index
    %c0_282 = arith.constant 0 : index
    %563 = vector.load %arg2[%562, %c0_282] : memref<64x32xf32, #tpu.memory_space<vmem>>, vector<1x32xf32>
    %564 = arith.addf %556, %563 : vector<1x32xf32>
    %cst_283 = arith.constant 1.250000e-01 : f32
    %565 = vector.broadcast %cst_283 : f32 to vector<1x32xf32>
    %566 = arith.mulf %564, %565 : vector<1x32xf32>
    %567 = arith.index_cast %c7_i32_248 : i32 to index
    %c0_284 = arith.constant 0 : index
    %568 = vector.load %arg8[%567, %c0_284] : memref<8x32xf32, #tpu.memory_space<vmem>>, vector<1x32xf32>
    tpu.vector_store %arg8[%567, %c0_284], %566 {strides = array<i32>} : memref<8x32xf32, #tpu.memory_space<vmem>>, vector<1x32xf32>,
    %c8_i32_285 = arith.constant 8 : i32
    %c0_286 = arith.constant 0 : index
    %c0_287 = arith.constant 0 : index
    %569 = vector.load %arg8[%c0_286, %c0_287] : memref<8x32xf32, #tpu.memory_space<vmem>>, vector<8x32xf32>
    %570 = arith.truncf %569 : vector<8x32xf32> to vector<8x32xbf16>
    %c0_288 = arith.constant 0 : index
    %c0_289 = arith.constant 0 : index
    %571 = vector.load %arg3[%c0_288, %c0_289] : memref<32x32xbf16, #tpu.memory_space<vmem>>, vector<32x32xbf16>
    %cst_290 = arith.constant dense<0.000000e+00> : vector<8x32xf32>
    %572 = tpu.matmul %570, %571, %cst_290 {dimension_numbers = #tpu.dot_dimension_numbers<[1], [0], [0], [1], [0, 0, 1, 1], [], []>} : vector<8x32xbf16>, vector<32x32xbf16>, vector<8x32xf32> -> vector<8x32xf32>
    %c0_291 = arith.constant 0 : index
    %c0_292 = arith.constant 0 : index
    %573 = vector.load %arg4[%c0_291, %c0_292] : memref<1x32xf32, #tpu.memory_space<vmem>>, vector<1x32xf32>
    %574 = vector.broadcast %573 : vector<1x32xf32> to vector<8x32xf32>
    %575 = arith.addf %572, %574 : vector<8x32xf32>
    %cst_293 = arith.constant 0.000000e+00 : f32
    %576 = vector.broadcast %cst_293 : f32 to vector<8x32xf32>
    %577 = arith.maximumf %575, %576 : vector<8x32xf32>
    %c0_294 = arith.constant 0 : index
    %c0_295 = arith.constant 0 : index
    %578 = vector.load %arg5[%c0_294, %c0_295] : memref<1x32xbf16, #tpu.memory_space<vmem>>, vector<1x32xbf16>
    %579 = arith.truncf %577 : vector<8x32xf32> to vector<8x32xbf16>
    %cst_296 = arith.constant dense<0.000000e+00> : vector<1x8xf32>
    %580 = tpu.matmul %578, %579, %cst_296 {dimension_numbers = #tpu.dot_dimension_numbers<[1], [1], [0], [0], [0, 0, 1, 0], [], []>} : vector<1x32xbf16>, vector<8x32xbf16>, vector<1x8xf32> -> vector<1x8xf32>
    %c0_297 = arith.constant 0 : index
    %c0_298 = arith.constant 0 : index
    %581 = vector.load %arg6[%c0_297, %c0_298] : memref<1x1xf32, #tpu.memory_space<vmem>>, vector<1x1xf32>
    %582 = vector.broadcast %581 : vector<1x1xf32> to vector<1x8xf32>
    %583 = arith.addf %580, %582 : vector<1x8xf32>
    %584 = arith.negf %583 : vector<1x8xf32>
    %585 = math.exp %584 : vector<1x8xf32>
    %cst_299 = arith.constant 1.000000e+00 : f32
    %586 = vector.broadcast %cst_299 : f32 to vector<1x8xf32>
    %587 = arith.addf %586, %585 : vector<1x8xf32>
    %588 = arith.divf %586, %587 : vector<1x8xf32>
    %c0_300 = arith.constant 0 : index
    %c0_301 = arith.constant 0 : index
    %589 = vector.load %arg7[%c0_300, %c0_301] : memref<1x8xf32, #tpu.memory_space<vmem>>, vector<1x8xf32>
    tpu.vector_store %arg7[%c0_300, %c0_301], %588 {strides = array<i32>} : memref<1x8xf32, #tpu.memory_space<vmem>>, vector<1x8xf32>,
    return
  }
  func.func @transform_0(%arg0: i32, %arg1: memref<64xi32, #tpu.memory_space<smem>>) -> (i32, i32) {
    %c0_i32 = arith.constant 0 : i32
    %c0_i32_0 = arith.constant 0 : i32
    %c0_i32_1 = arith.constant 0 : i32
    return %c0_i32, %c0_i32_0 : i32, i32
  }
  func.func @transform_1(%arg0: i32, %arg1: memref<64xi32, #tpu.memory_space<smem>>) -> (i32, i32) {
    %c0_i32 = arith.constant 0 : i32
    %c0_i32_0 = arith.constant 0 : i32
    %c0_i32_1 = arith.constant 0 : i32
    return %c0_i32, %c0_i32_0 : i32, i32
  }
  func.func @transform_2(%arg0: i32, %arg1: memref<64xi32, #tpu.memory_space<smem>>) -> (i32, i32) {
    %c0_i32 = arith.constant 0 : i32
    %c0_i32_0 = arith.constant 0 : i32
    %c0_i32_1 = arith.constant 0 : i32
    return %c0_i32, %c0_i32_0 : i32, i32
  }
  func.func @transform_3(%arg0: i32, %arg1: memref<64xi32, #tpu.memory_space<smem>>) -> (i32, i32) {
    %c0_i32 = arith.constant 0 : i32
    %c0_i32_0 = arith.constant 0 : i32
    %c0_i32_1 = arith.constant 0 : i32
    return %c0_i32, %c0_i32_0 : i32, i32
  }
  func.func @transform_4(%arg0: i32, %arg1: memref<64xi32, #tpu.memory_space<smem>>) -> (i32, i32) {
    %c0_i32 = arith.constant 0 : i32
    %c0_i32_0 = arith.constant 0 : i32
    %c0_i32_1 = arith.constant 0 : i32
    return %c0_i32, %c0_i32_0 : i32, i32
  }
  func.func @transform_5(%arg0: i32, %arg1: memref<64xi32, #tpu.memory_space<smem>>) -> (i32, i32) {
    %c0_i32 = arith.constant 0 : i32
    %c0_i32_0 = arith.constant 0 : i32
    return %c0_i32, %arg0 : i32, i32
  }
}

</mosaic_0001>

<bundles_post_ra>
// kernel: tpu_custom_call.1
= control target key start
LH: loop header
LB: loop body
LE: loop exit
PB: predicated region body
PF: predicated region fallthrough
CT: control target
= control target key end

     0   :  { %s1955_s0 = inlined_call_operand.vmem [shape: s32[64], index: 0, kind: input, shape index: {}]   ;;  %s1956_s1 = inlined_call_operand.vmem [shape: f32[64,32], index: 1, kind: input, shape index: {}]   ;;  %s1957_s2 = inlined_call_operand.vmem [shape: bf16[32,32], index: 2, kind: input, shape index: {}]   ;;  %s1958_s3 = inlined_call_operand.vmem [shape: f32[1,32], index: 3, kind: input, shape index: {}]   ;;  %s1959_s4 = inlined_call_operand.vmem [shape: bf16[1,32], index: 4, kind: input, shape index: {}]   ;;  %s1960_s6 = inlined_call_operand.hbm [shape: f32[1,8], index: 6, kind: output, shape index: {}]   ;;  %s1961_s5 = inlined_call_operand.<no memory space> [shape: f32[1,1], index: 5, kind: input, shape index: {}]  }
   0x1   :  { %s11_s23 = sshll.u32 %s1955_s0, 4  ;;  %v15_v0 = vstv %s1961_s5  ;;  %s12_s23 = int_to_ptr.vmem [resolvable:$true] %s11_s23 }
   0x2   :  { %16 = vst [vmem:[#allocation5] sm:$0x1] %v15_v0  ;;  %s1394_s26 = scalar_lea.vmem %s12_s23, 16  ;;  %p1399_p1 = scmp.lt.s32.totalorder %s12_s23, %s12_s23 }
   0x3   :  { %p1395_p0 = scmp.ne.s32.totalorder %s12_s23, %s1394_s26  ;;  %p1400_p2 = scmp.lt.s32.totalorder %s1394_s26, %s1394_s26 }
   0x5   :  { %p1401_p3 = por %p1400_p2, %p1399_p1 }
   0x7   :  { %p1402_p4 = pnand %p1401_p3, %p1395_p0 }
   0x9   :  { %1405 = shalt.err (!%p1402_p4)  }
   0xa   :  { %s1432_s27 = smov [#allocation4]  }
   0xb   :  { %14 = dma.vmem_to_smem %s12_s23, 16, %s1432_s27, [#allocation3] }
   0xc   :  { %1428 = dma.done.wait [#allocation3], 16 }
   0xd   :  { %1429 = vsyncadd [#allocation3], 4294967280 }
   0xe   :  { %18 = sfence }
   0xf   :  { %v1388_v1 = vld [vmem:[%s1957_s2] sm:$0xff]   ;;  %v1433_v2 = vmov 0.0   ;;  %v1389_v3 = vld [vmem:[%s1957_s2 + $0x8] sm:$0xff]   ;;  %vm1434_vm0 = vmmov 0   ;;  %s33_s30 = sld [smem:[#allocation4]]  ;;  %s851_s7 = sld [smem:[#allocation4 + $0x1]] }
  0x10   :  { %1368 = vmatprep.subr.bf16.mxu0 %v1433_v2  ;;  %1376 = vmatprep.subr.bf16.mxu1 %v1433_v2  ;;  %s1484_s8 = sld [smem:[#allocation4 + $0x2]]  ;;  %s1486_s9 = sld [smem:[#allocation4 + $0x3]] }
  0x11   :  { %1369 = vmatpush3.bf16.msra.mxu0 %v1388_v1  ;;  %1372 = vmatprep.mubr.msk.bf16.mxu0 %vm1434_vm0, %v1433_v2 }
  0x12   :  { %1370 = vmatprep.subr.bf16.mxu0 %v1433_v2  ;;  %1378 = vmatprep.mubr.msk.bf16.mxu1 %vm1434_vm0, %v1433_v2 }
  0x13   :  { %19 = vsyncpa [#allocation7], 0  ;;  %s1488_s10 = sld [smem:[#allocation4 + $0x4]]  ;;  %s1490_s11 = sld [smem:[#allocation4 + $0x5]]  ;;  %vm105_vm1 = vcmask 253952   ;;  %vm657_vm2 = vcmask 261120  }
  0x14   :  { %s1492_s12 = sld [smem:[#allocation4 + $0x6]]  ;;  %s1494_s13 = sld [smem:[#allocation4 + $0x7]]  ;;  %vm766_vm3 = vcmask 57344  }
  0x15   :  { %1371 = vmatpush3.bf16.msra.mxu0 %v1389_v3  ;;  %s1496_s2 = sld [smem:[#allocation4 + $0x8]]  ;;  %s1498_s14 = sld [smem:[#allocation4 + $0x9]] }
  0x16   :  { %s1500_s15 = sld [smem:[#allocation4 + $0xa]]  ;;  %s1502_s16 = sld [smem:[#allocation4 + $0xb]] }
  0x17   :  { %p34_p5 = scmp.gt.s32.totalorder %s33_s30, 0  ;;  %p846_p6 = scmp.lt.s32.totalorder %s33_s30, 63 }
  0x18   :  { %p43_p7 = scmp.gt.s32.totalorder %s851_s7, 0  ;;  %p852_p8 = scmp.lt.s32.totalorder %s851_s7, 63 }
  0x19   :  { %s1963_s30 = smov (!%p34_p5, %s33_s30), 0  ;;  %p52_p9 = scmp.gt.s32.totalorder %s1484_s8, 0 }
  0x1a   :  { %s1965_s7 = smov (!%p43_p7, %s851_s7), 0  ;;  %s1967_s30 = smov (!%p846_p6, %s1963_s30), 63 }
  0x1b   :  { %s1969_s7 = smov (!%p852_p8, %s1965_s7), 63  ;;  %s38_s19 = scalar_lea.vmem %s1956_s1, %s1967_s30 }
  0x1c   :  { %v39_v4 = vld [vmem:[%s38_s19] sm:$0x1]  ;;  %s47_s22 = scalar_lea.vmem %s1956_s1, %s1969_s7  ;;  %p858_p10 = scmp.lt.s32.totalorder %s1484_s8, 63 }
  0x1d   :  { %v48_v5 = vld [vmem:[%s47_s22] sm:$0x1]  ;;  %s1971_s8 = smov (!%p52_p9, %s1484_s8), 0  ;;  %p61_p11 = scmp.gt.s32.totalorder %s1486_s9, 0 }
  0x1e   :  { %p864_p12 = scmp.lt.s32.totalorder %s1486_s9, 63  ;;  %v49_v6 = vadd.f32 %v48_v5, %v39_v4  ;;  %s1973_s8 = smov (!%p858_p10, %s1971_s8), 63 }
  0x1f   :  { %s1975_s9 = smov (!%p61_p11, %s1486_s9), 0  ;;  %s56_s25 = scalar_lea.vmem %s1956_s1, %s1973_s8 }
  0x20   :  { %p70_p13 = scmp.gt.s32.totalorder %s1488_s10, 0  ;;  %v57_v7 = vld [vmem:[%s56_s25] sm:$0x1]  ;;  %s1977_s9 = smov (!%p864_p12, %s1975_s9), 63 }
  0x21   :  { %v58_v8 = vadd.f32 %v57_v7, %v49_v6  ;;  %s65_s0 = scalar_lea.vmem %s1956_s1, %s1977_s9  ;;  %p870_p0 = scmp.lt.s32.totalorder %s1488_s10, 63 }
  0x22   :  { %s71_s26 = scalar_select %p70_p13, %s1488_s10, 0  ;;  %v66_v9 = vld [vmem:[%s65_s0] sm:$0x1] }
  0x23   :  { %p79_p1 = scmp.gt.s32.totalorder %s1490_s11, 0  ;;  %p876_p2 = scmp.lt.s32.totalorder %s1490_s11, 63  ;;  %v67_v10 = vadd.f32 %v66_v9, %v58_v8 }
  0x24   :  { %s1979_s26 = smov (!%p870_p0, %s71_s26), 63  ;;  %p88_p3 = scmp.gt.s32.totalorder %s1492_s12, 0 }
  0x25   :  { %s1981_s11 = smov (!%p79_p1, %s1490_s11), 0  ;;  %s74_s30 = scalar_lea.vmem %s1956_s1, %s1979_s26 }
  0x26   :  { %v75_v11 = vld [vmem:[%s74_s30] sm:$0x1]  ;;  %s1983_s11 = smov (!%p876_p2, %s1981_s11), 63  ;;  %p882_p4 = scmp.lt.s32.totalorder %s1492_s12, 63 }
  0x27   :  { %v76_v12 = vadd.f32 %v75_v11, %v67_v10  ;;  %s89_s7 = scalar_select %p88_p3, %s1492_s12, 0 }
  0x28   :  { %s83_s10 = scalar_lea.vmem %s1956_s1, %s1983_s11  ;;  %p97_p5 = scmp.gt.s32.totalorder %s1494_s13, 0 }
  0x29   :  { %v84_v13 = vld [vmem:[%s83_s10] sm:$0x1]  ;;  %p888_p6 = scmp.lt.s32.totalorder %s1494_s13, 63  ;;  %s1985_s7 = smov (!%p882_p4, %s89_s7), 63 }
  0x2a   :  { %v85_v14 = vadd.f32 %v84_v13, %v76_v12  ;;  %s1987_s13 = smov (!%p97_p5, %s1494_s13), 0  ;;  %s92_s19 = scalar_lea.vmem %s1956_s1, %s1985_s7 }
  0x2b   :  { %p110_p7 = scmp.gt.s32.totalorder %s1496_s2, 0  ;;  %v93_v15 = vld [vmem:[%s92_s19] sm:$0x1]  ;;  %s1989_s13 = smov (!%p888_p6, %s1987_s13), 63 }
  0x2c   :  { %v94_v16 = vadd.f32 %v93_v15, %v85_v14  ;;  %s101_s21 = scalar_lea.vmem %s1956_s1, %s1989_s13  ;;  %p894_p8 = scmp.lt.s32.totalorder %s1496_s2, 63 }
  0x2d   :  { %s111_s11 = scalar_select %p110_p7, %s1496_s2, 0  ;;  %v102_v17 = vld [vmem:[%s101_s21] sm:$0x1] }
  0x2e   :  { %p119_p9 = scmp.gt.s32.totalorder %s1498_s14, 0  ;;  %p900_p10 = scmp.lt.s32.totalorder %s1498_s14, 63  ;;  %v103_v18 = vadd.f32 %v102_v17, %v94_v16 }
  0x2f   :  { %s1991_s11 = smov (!%p894_p8, %s111_s11), 63  ;;  %p128_p11 = scmp.gt.s32.totalorder %s1500_s15, 0 }
  0x30   :  { %s1993_s14 = smov (!%p119_p9, %s1498_s14), 0  ;;  %v104_v19 = vmul.f32 0.125, %v103_v18  ;;  %s114_s24 = scalar_lea.vmem %s1956_s1, %s1991_s11 }
  0x31   :  { %s1995_s14 = smov (!%p900_p10, %s1993_s14), 63  ;;  %p906_p12 = scmp.lt.s32.totalorder %s1500_s15, 63  ;;  %v115_v20 = vld [vmem:[%s114_s24] sm:$0x1] }
  0x32   :  { %106 = vst.msk [vmem:[#allocation2] sm:$0x1] %vm105_vm1, %v104_v19  ;;  %s129_s13 = scalar_select %p128_p11, %s1500_s15, 0 }
  0x33   :  { %s123_s26 = scalar_lea.vmem %s1956_s1, %s1995_s14  ;;  %p137_p13 = scmp.gt.s32.totalorder %s1502_s16, 0 }
  0x34   :  { %p912_p0 = scmp.lt.s32.totalorder %s1502_s16, 63  ;;  %s1997_s13 = smov (!%p906_p12, %s129_s13), 63  ;;  %v124_v21 = vld [vmem:[%s123_s26] sm:$0x1] }
  0x35   :  { %s1999_s16 = smov (!%p137_p13, %s1502_s16), 0  ;;  %s132_s0 = scalar_lea.vmem %s1956_s1, %s1997_s13  ;;  %v125_v22 = vadd.f32 %v124_v21, %v115_v20 }
  0x36   :  { %s917_s5 = sld [smem:[#allocation4 + $0xc]]  ;;  %s2001_s16 = smov (!%p912_p0, %s1999_s16), 63  ;;  %v133_v23 = vld [vmem:[%s132_s0] sm:$0x1] }
  0x37   :  { %s923_s29 = sld [smem:[#allocation4 + $0xd]]  ;;  %s1568_s30 = sld [smem:[#allocation4 + $0xe]]  ;;  %v134_v24 = vadd.f32 %v133_v23, %v125_v22 }
  0x38   :  { %s141_s15 = scalar_lea.vmem %s1956_s1, %s2001_s16  ;;  %s1573_s8 = sld [smem:[#allocation4 + $0xf]] }
  0x39   :  { %s1575_s9 = sld [smem:[#allocation4 + $0x10]]  ;;  %s1577_s10 = sld [smem:[#allocation4 + $0x11]]  ;;  %v142_v25 = vld [vmem:[%s141_s15] sm:$0x1] }
  0x3a   :  { %s1579_s17 = sld [smem:[#allocation4 + $0x12]]  ;;  %s1581_s18 = sld [smem:[#allocation4 + $0x13]]  ;;  %v143_v26 = vadd.f32 %v142_v25, %v134_v24 }
  0x3b   :  { %s1583_s19 = sld [smem:[#allocation4 + $0x14]]  ;;  %s1585_s16 = sld [smem:[#allocation4 + $0x15]] }
  0x3c   :  { %p146_p1 = scmp.gt.s32.totalorder %s917_s5, 0  ;;  %p918_p2 = scmp.lt.s32.totalorder %s917_s5, 63 }
  0x3d   :  { %p155_p3 = scmp.gt.s32.totalorder %s923_s29, 0  ;;  %p924_p4 = scmp.lt.s32.totalorder %s923_s29, 63 }
  0x3e   :  { %s2003_s5 = smov (!%p146_p1, %s917_s5), 0  ;;  %p164_p5 = scmp.gt.s32.totalorder %s1568_s30, 0 }
  0x3f   :  { %s2005_s5 = smov (!%p918_p2, %s2003_s5), 63  ;;  %s2007_s29 = smov (!%p155_p3, %s923_s29), 0 }
  0x40   :  { %s150_s20 = scalar_lea.vmem %s1956_s1, %s2005_s5  ;;  %s2009_s29 = smov (!%p924_p4, %s2007_s29), 63 }
  0x41   :  { %v151_v27 = vld [vmem:[%s150_s20] sm:$0x1]  ;;  %s165_s21 = scalar_select %p164_p5, %s1568_s30, 0 }
  0x42   :  { %v152_v28 = vadd.f32 %v151_v27, %v143_v26  ;;  %s159_s24 = scalar_lea.vmem %s1956_s1, %s2009_s29  ;;  %p930_p6 = scmp.lt.s32.totalorder %s1568_s30, 63 }
  0x43   :  { %v160_v29 = vld [vmem:[%s159_s24] sm:$0x1]  ;;  %p173_p7 = scmp.gt.s32.totalorder %s1573_s8, 0  ;;  %p936_p8 = scmp.lt.s32.totalorder %s1573_s8, 63 }
  0x44   :  { %v161_v30 = vadd.f32 %v160_v29, %v152_v28  ;;  %s2011_s21 = smov (!%p930_p6, %s165_s21), 63  ;;  %p185_p9 = scmp.gt.s32.totalorder %s1575_s9, 0 }
  0x45   :  { %s2013_s8 = smov (!%p173_p7, %s1573_s8), 0  ;;  %s168_s25 = scalar_lea.vmem %s1956_s1, %s2011_s21 }
  0x46   :  { %v169_v31 = vld [vmem:[%s168_s25] sm:$0x1]  ;;  %s2015_s8 = smov (!%p936_p8, %s2013_s8), 63  ;;  %p942_p10 = scmp.lt.s32.totalorder %s1575_s9, 63 }
  0x47   :  { %v170_v32 = vadd.f32 %v169_v31, %v161_v30  ;;  %s186_s26 = scalar_select %p185_p9, %s1575_s9, 0 }
  0x48   :  { %s177_s0 = scalar_lea.vmem %s1956_s1, %s2015_s8  ;;  %p194_p11 = scmp.gt.s32.totalorder %s1577_s10, 0 }
  0x49   :  { %v178_v33 = vld [vmem:[%s177_s0] sm:$0x1]  ;;  %p948_p12 = scmp.lt.s32.totalorder %s1577_s10, 63  ;;  %s2017_s26 = smov (!%p942_p10, %s186_s26), 63 }
  0x4a   :  { %v179_v34 = vadd.f32 %v178_v33, %v170_v32  ;;  %s2019_s10 = smov (!%p194_p11, %s1577_s10), 0  ;;  %s189_s30 = scalar_lea.vmem %s1956_s1, %s2017_s26 }
  0x4b   :  { %p203_p13 = scmp.gt.s32.totalorder %s1579_s17, 0  ;;  %s2021_s10 = smov (!%p948_p12, %s2019_s10), 63  ;;  %v190_v36 = vld [vmem:[%s189_s30] sm:$0x1] }
  0x4c   :  { %v180_v35 = vmul.f32 0.125, %v179_v34  ;;  %s198_s8 = scalar_lea.vmem %s1956_s1, %s2021_s10  ;;  %p954_p0 = scmp.lt.s32.totalorder %s1579_s17, 63 }
  0x4d   :  { %s204_s7 = scalar_select %p203_p13, %s1579_s17, 0  ;;  %v199_v37 = vld [vmem:[%s198_s8] sm:$0x1] }
  0x4e   :  { %181 = vst.msk [vmem:[#allocation2 + $0x1] sm:$0x1] %vm105_vm1, %v180_v35  ;;  %p212_p1 = scmp.gt.s32.totalorder %s1581_s18, 0  ;;  %p960_p2 = scmp.lt.s32.totalorder %s1581_s18, 63  ;;  %v200_v38 = vadd.f32 %v199_v37, %v190_v36 }
  0x4f   :  { %s2023_s7 = smov (!%p954_p0, %s204_s7), 63  ;;  %p221_p3 = scmp.gt.s32.totalorder %s1583_s19, 0 }
  0x50   :  { %s2025_s18 = smov (!%p212_p1, %s1581_s18), 0  ;;  %s207_s12 = scalar_lea.vmem %s1956_s1, %s2023_s7 }
  0x51   :  { %s2027_s18 = smov (!%p960_p2, %s2025_s18), 63  ;;  %v208_v39 = vld [vmem:[%s207_s12] sm:$0x1]  ;;  %p966_p4 = scmp.lt.s32.totalorder %s1583_s19, 63 }
  0x52   :  { %s222_s20 = scalar_select %p221_p3, %s1583_s19, 0  ;;  %v209_v40 = vadd.f32 %v208_v39, %v200_v38 }
  0x53   :  { %s216_s17 = scalar_lea.vmem %s1956_s1, %s2027_s18  ;;  %p230_p5 = scmp.gt.s32.totalorder %s1585_s16, 0 }
  0x54   :  { %p972_p6 = scmp.lt.s32.totalorder %s1585_s16, 63  ;;  %s2029_s20 = smov (!%p966_p4, %s222_s20), 63  ;;  %v217_v41 = vld [vmem:[%s216_s17] sm:$0x1] }
  0x55   :  { %s2031_s16 = smov (!%p230_p5, %s1585_s16), 0  ;;  %s225_s24 = scalar_lea.vmem %s1956_s1, %s2029_s20  ;;  %v218_v42 = vadd.f32 %v217_v41, %v209_v40 }
  0x56   :  { %s977_s13 = sld [smem:[#allocation4 + $0x16]]  ;;  %s2033_s16 = smov (!%p972_p6, %s2031_s16), 63  ;;  %v226_v43 = vld [vmem:[%s225_s24] sm:$0x1] }
  0x57   :  { %s983_s2 = sld [smem:[#allocation4 + $0x17]]  ;;  %s1639_s25 = sld [smem:[#allocation4 + $0x18]]  ;;  %v227_v44 = vadd.f32 %v226_v43, %v218_v42 }
  0x58   :  { %s234_s19 = scalar_lea.vmem %s1956_s1, %s2033_s16  ;;  %s1644_s27 = sld [smem:[#allocation4 + $0x19]] }
  0x59   :  { %s1646_s28 = sld [smem:[#allocation4 + $0x1a]]  ;;  %s1648_s0 = sld [smem:[#allocation4 + $0x1b]]  ;;  %v235_v45 = vld [vmem:[%s234_s19] sm:$0x1] }
  0x5a   :  { %s1650_s5 = sld [smem:[#allocation4 + $0x1c]]  ;;  %s1652_s29 = sld [smem:[#allocation4 + $0x1d]]  ;;  %v236_v46 = vadd.f32 %v235_v45, %v227_v44 }
  0x5b   :  { %s1654_s30 = sld [smem:[#allocation4 + $0x1e]]  ;;  %s1656_s16 = sld [smem:[#allocation4 + $0x1f]] }
  0x5c   :  { %p239_p7 = scmp.gt.s32.totalorder %s977_s13, 0  ;;  %p978_p8 = scmp.lt.s32.totalorder %s977_s13, 63 }
  0x5d   :  { %p248_p9 = scmp.gt.s32.totalorder %s983_s2, 0  ;;  %p984_p10 = scmp.lt.s32.totalorder %s983_s2, 63 }
  0x5e   :  { %s2035_s13 = smov (!%p239_p7, %s977_s13), 0  ;;  %p260_p11 = scmp.gt.s32.totalorder %s1639_s25, 0 }
  0x5f   :  { %s2037_s13 = smov (!%p978_p8, %s2035_s13), 63  ;;  %s2039_s2 = smov (!%p248_p9, %s983_s2), 0 }
  0x60   :  { %s243_s15 = scalar_lea.vmem %s1956_s1, %s2037_s13  ;;  %s2041_s2 = smov (!%p984_p10, %s2039_s2), 63 }
  0x61   :  { %v244_v47 = vld [vmem:[%s243_s15] sm:$0x1]  ;;  %s261_s8 = scalar_select %p260_p11, %s1639_s25, 0 }
  0x62   :  { %v245_v48 = vadd.f32 %v244_v47, %v236_v46  ;;  %s252_s12 = scalar_lea.vmem %s1956_s1, %s2041_s2  ;;  %p990_p12 = scmp.lt.s32.totalorder %s1639_s25, 63 }
  0x63   :  { %v253_v49 = vld [vmem:[%s252_s12] sm:$0x1]  ;;  %p269_p13 = scmp.gt.s32.totalorder %s1644_s27, 0  ;;  %p996_p0 = scmp.lt.s32.totalorder %s1644_s27, 63 }
  0x64   :  { %v254_v50 = vadd.f32 %v253_v49, %v245_v48  ;;  %s2043_s8 = smov (!%p990_p12, %s261_s8), 63  ;;  %p278_p1 = scmp.gt.s32.totalorder %s1646_s28, 0 }
  0x65   :  { %s2045_s27 = smov (!%p269_p13, %s1644_s27), 0  ;;  %s264_s21 = scalar_lea.vmem %s1956_s1, %s2043_s8 }
  0x66   :  { %v255_v51 = vmul.f32 0.125, %v254_v50  ;;  %s2047_s27 = smov (!%p996_p0, %s2045_s27), 63  ;;  %v265_v52 = vld [vmem:[%s264_s21] sm:$0x1]  ;;  %p1002_p2 = scmp.lt.s32.totalorder %s1646_s28, 63 }
  0x67   :  { %s279_s17 = scalar_select %p278_p1, %s1646_s28, 0 }
  0x68   :  { %256 = vst.msk [vmem:[#allocation2 + $0x2] sm:$0x1] %vm105_vm1, %v255_v51  ;;  %s273_s24 = scalar_lea.vmem %s1956_s1, %s2047_s27  ;;  %p287_p3 = scmp.gt.s32.totalorder %s1648_s0, 0 }
  0x69   :  { %v274_v53 = vld [vmem:[%s273_s24] sm:$0x1]  ;;  %p1008_p4 = scmp.lt.s32.totalorder %s1648_s0, 63  ;;  %s2049_s17 = smov (!%p1002_p2, %s279_s17), 63 }
  0x6a   :  { %v275_v54 = vadd.f32 %v274_v53, %v265_v52  ;;  %s2051_s0 = smov (!%p287_p3, %s1648_s0), 0  ;;  %s282_s25 = scalar_lea.vmem %s1956_s1, %s2049_s17 }
  0x6b   :  { %p296_p5 = scmp.gt.s32.totalorder %s1650_s5, 0  ;;  %v283_v55 = vld [vmem:[%s282_s25] sm:$0x1]  ;;  %s2053_s0 = smov (!%p1008_p4, %s2051_s0), 63 }
  0x6c   :  { %v284_v56 = vadd.f32 %v283_v55, %v275_v54  ;;  %s291_s27 = scalar_lea.vmem %s1956_s1, %s2053_s0  ;;  %p1014_p6 = scmp.lt.s32.totalorder %s1650_s5, 63 }
  0x6d   :  { %s297_s26 = scalar_select %p296_p5, %s1650_s5, 0  ;;  %v292_v57 = vld [vmem:[%s291_s27] sm:$0x1] }
  0x6e   :  { %p305_p7 = scmp.gt.s32.totalorder %s1652_s29, 0  ;;  %p1020_p8 = scmp.lt.s32.totalorder %s1652_s29, 63  ;;  %v293_v58 = vadd.f32 %v292_v57, %v284_v56 }
  0x6f   :  { %s2055_s26 = smov (!%p1014_p6, %s297_s26), 63  ;;  %p314_p9 = scmp.gt.s32.totalorder %s1654_s30, 0 }
  0x70   :  { %s2057_s29 = smov (!%p305_p7, %s1652_s29), 0  ;;  %s300_s14 = scalar_lea.vmem %s1956_s1, %s2055_s26 }
  0x71   :  { %v301_v59 = vld [vmem:[%s300_s14] sm:$0x1]  ;;  %s2059_s29 = smov (!%p1020_p8, %s2057_s29), 63  ;;  %p1026_p10 = scmp.lt.s32.totalorder %s1654_s30, 63 }
  0x72   :  { %v302_v60 = vadd.f32 %v301_v59, %v293_v58  ;;  %s315_s15 = scalar_select %p314_p9, %s1654_s30, 0 }
  0x73   :  { %s309_s8 = scalar_lea.vmem %s1956_s1, %s2059_s29  ;;  %p323_p11 = scmp.gt.s32.totalorder %s1656_s16, 0 }
  0x74   :  { %v310_v61 = vld [vmem:[%s309_s8] sm:$0x1]  ;;  %p1032_p12 = scmp.lt.s32.totalorder %s1656_s16, 63  ;;  %s2061_s15 = smov (!%p1026_p10, %s315_s15), 63 }
  0x75   :  { %v311_v62 = vadd.f32 %v310_v61, %v302_v60  ;;  %s2063_s16 = smov (!%p323_p11, %s1656_s16), 0  ;;  %s318_s12 = scalar_lea.vmem %s1956_s1, %s2061_s15 }
  0x76   :  { %s1037_s20 = sld [smem:[#allocation4 + $0x20]]  ;;  %v319_v63 = vld [vmem:[%s318_s12] sm:$0x1]  ;;  %s2065_s16 = smov (!%p1032_p12, %s2063_s16), 63 }
  0x77   :  { %v320_v0 = vadd.f32 %v319_v63, %v311_v62  ;;  %s1043_s10 = sld [smem:[#allocation4 + $0x21]]  ;;  %s1710_s21 = sld [smem:[#allocation4 + $0x22]] }
  0x78   :  { %s327_s30 = scalar_lea.vmem %s1956_s1, %s2065_s16  ;;  %s1715_s22 = sld [smem:[#allocation4 + $0x23]] }
  0x79   :  { %v328_v1 = vld [vmem:[%s327_s30] sm:$0x1]  ;;  %s1717_s23 = sld [smem:[#allocation4 + $0x24]]  ;;  %s1719_s24 = sld [smem:[#allocation4 + $0x25]] }
  0x7a   :  { %v329_v2 = vadd.f32 %v328_v1, %v320_v0  ;;  %s1721_s13 = sld [smem:[#allocation4 + $0x26]]  ;;  %s1723_s2 = sld [smem:[#allocation4 + $0x27]] }
  0x7b   :  { %s1725_s25 = sld [smem:[#allocation4 + $0x28]]  ;;  %s1727_s16 = sld [smem:[#allocation4 + $0x29]] }
  0x7c   :  { %p335_p13 = scmp.gt.s32.totalorder %s1037_s20, 0  ;;  %p1038_p0 = scmp.lt.s32.totalorder %s1037_s20, 63  ;;  %v330_v3 = vmul.f32 0.125, %v329_v2 }
  0x7d   :  { %p344_p1 = scmp.gt.s32.totalorder %s1043_s10, 0  ;;  %p1044_p2 = scmp.lt.s32.totalorder %s1043_s10, 63 }
  0x7e   :  { %s2067_s20 = smov (!%p335_p13, %s1037_s20), 0  ;;  %331 = vst.msk [vmem:[#allocation2 + $0x3] sm:$0x1] %vm105_vm1, %v330_v3  ;;  %p353_p3 = scmp.gt.s32.totalorder %s1710_s21, 0 }
  0x7f   :  { %s2069_s20 = smov (!%p1038_p0, %s2067_s20), 63  ;;  %s2071_s10 = smov (!%p344_p1, %s1043_s10), 0 }
  0x80   :  { %s339_s19 = scalar_lea.vmem %s1956_s1, %s2069_s20  ;;  %s2073_s10 = smov (!%p1044_p2, %s2071_s10), 63 }
  0x81   :  { %v340_v4 = vld [vmem:[%s339_s19] sm:$0x1]  ;;  %s354_s27 = scalar_select %p353_p3, %s1710_s21, 0 }
  0x82   :  { %s348_s14 = scalar_lea.vmem %s1956_s1, %s2073_s10  ;;  %p1050_p4 = scmp.lt.s32.totalorder %s1710_s21, 63 }
  0x83   :  { %v349_v5 = vld [vmem:[%s348_s14] sm:$0x1]  ;;  %p362_p5 = scmp.gt.s32.totalorder %s1715_s22, 0  ;;  %p1056_p6 = scmp.lt.s32.totalorder %s1715_s22, 63 }
  0x84   :  { %v350_v6 = vadd.f32 %v349_v5, %v340_v4  ;;  %s2075_s27 = smov (!%p1050_p4, %s354_s27), 63  ;;  %p371_p7 = scmp.gt.s32.totalorder %s1717_s23, 0 }
  0x85   :  { %s2077_s22 = smov (!%p362_p5, %s1715_s22), 0  ;;  %s357_s5 = scalar_lea.vmem %s1956_s1, %s2075_s27 }
  0x86   :  { %v358_v7 = vld [vmem:[%s357_s5] sm:$0x1]  ;;  %s2079_s22 = smov (!%p1056_p6, %s2077_s22), 63  ;;  %p1062_p8 = scmp.lt.s32.totalorder %s1717_s23, 63 }
  0x87   :  { %v359_v8 = vadd.f32 %v358_v7, %v350_v6  ;;  %s372_s8 = scalar_select %p371_p7, %s1717_s23, 0  ;;  %v704_v6 = vld [vmem:[#allocation5] sm:$0x1]  ;;  %v1435_v7 = vmov 0  }
  0x88   :  { %s366_s12 = scalar_lea.vmem %s1956_s1, %s2079_s22  ;;  %p380_p9 = scmp.gt.s32.totalorder %s1719_s24, 0  ;;  %1387 = vset.pattern.permute.xlu0 %v1435_v7 }
  0x89   :  { %v367_v9 = vld [vmem:[%s366_s12] sm:$0x1]  ;;  %p1068_p10 = scmp.lt.s32.totalorder %s1719_s24, 63  ;;  %s2081_s8 = smov (!%p1062_p8, %s372_s8), 63  ;;  %707 = vperm.xlu0 %1387, %v704_v6  }
  0x8a   :  { %v368_v10 = vadd.f32 %v367_v9, %v359_v8  ;;  %s2083_s24 = smov (!%p380_p9, %s1719_s24), 0  ;;  %s375_s21 = scalar_lea.vmem %s1956_s1, %s2081_s8  ;;  %v1229_v8 = vld [vmem:[%s1958_s3] ss:$0 sm:$0xff] }
  0x8b   :  { %p389_p11 = scmp.gt.s32.totalorder %s1721_s13, 0  ;;  %v376_v11 = vld [vmem:[%s375_s21] sm:$0x1]  ;;  %s2085_s24 = smov (!%p1068_p10, %s2083_s24), 63 }
  0x8c   :  { %v377_v12 = vadd.f32 %v376_v11, %v368_v10  ;;  %s384_s22 = scalar_lea.vmem %s1956_s1, %s2085_s24  ;;  %p1074_p12 = scmp.lt.s32.totalorder %s1721_s13, 63 }
  0x8d   :  { %s390_s17 = scalar_select %p389_p11, %s1721_s13, 0  ;;  %v385_v13 = vld [vmem:[%s384_s22] sm:$0x1] }
  0x8e   :  { %p398_p13 = scmp.gt.s32.totalorder %s1723_s2, 0  ;;  %p1080_p0 = scmp.lt.s32.totalorder %s1723_s2, 63  ;;  %v386_v14 = vadd.f32 %v385_v13, %v377_v12 }
  0x8f   :  { %s2087_s17 = smov (!%p1074_p12, %s390_s17), 63  ;;  %p410_p1 = scmp.gt.s32.totalorder %s1725_s25, 0 }
  0x90   :  { %s2089_s2 = smov (!%p398_p13, %s1723_s2), 0  ;;  %s393_s18 = scalar_lea.vmem %s1956_s1, %s2087_s17 }
  0x91   :  { %v394_v15 = vld [vmem:[%s393_s18] sm:$0x1]  ;;  %s2091_s2 = smov (!%p1080_p0, %s2089_s2), 63  ;;  %p1086_p2 = scmp.lt.s32.totalorder %s1725_s25, 63 }
  0x92   :  { %v395_v16 = vadd.f32 %v394_v15, %v386_v14  ;;  %s411_s19 = scalar_select %p410_p1, %s1725_s25, 0 }
  0x93   :  { %s402_s27 = scalar_lea.vmem %s1956_s1, %s2091_s2  ;;  %p419_p3 = scmp.gt.s32.totalorder %s1727_s16, 0 }
  0x94   :  { %v403_v17 = vld [vmem:[%s402_s27] sm:$0x1]  ;;  %p1092_p4 = scmp.lt.s32.totalorder %s1727_s16, 63  ;;  %s2093_s19 = smov (!%p1086_p2, %s411_s19), 63 }
  0x95   :  { %v404_v18 = vadd.f32 %v403_v17, %v395_v16  ;;  %s2095_s16 = smov (!%p419_p3, %s1727_s16), 0  ;;  %s414_s14 = scalar_lea.vmem %s1956_s1, %s2093_s19  ;;  %v702_v17 = vld [vmem:[%s1959_s4] sm:$0x1] }
  0x96   :  { %s1097_s15 = sld [smem:[#allocation4 + $0x2a]]  ;;  %s2097_s16 = smov (!%p1092_p4, %s2095_s16), 63  ;;  %v415_v20 = vld [vmem:[%s414_s14] sm:$0x1] }
  0x97   :  { %v405_v19 = vmul.f32 0.125, %v404_v18  ;;  %s1103_s0 = sld [smem:[#allocation4 + $0x2b]]  ;;  %s1782_s5 = sld [smem:[#allocation4 + $0x2c]]  ;;  %v710_v18 = vlaneseq }
  0x98   :  { %s423_s8 = scalar_lea.vmem %s1956_s1, %s2097_s16  ;;  %s1787_s9 = sld [smem:[#allocation4 + $0x2d]] }
  0x99   :  { %406 = vst.msk [vmem:[#allocation2 + $0x4] sm:$0x1] %vm105_vm1, %v405_v19  ;;  %s1789_s11 = sld [smem:[#allocation4 + $0x2e]]  ;;  %s1791_s12 = sld [smem:[#allocation4 + $0x2f]]  ;;  %v424_v21 = vld [vmem:[%s423_s8] sm:$0x1] }
  0x9a   :  { %s1793_s20 = sld [smem:[#allocation4 + $0x30]]  ;;  %s1795_s10 = sld [smem:[#allocation4 + $0x31]]  ;;  %v425_v22 = vadd.f32 %v424_v21, %v415_v20  ;;  %v711_v19 = vshrl.u32 %v710_v18, 7 }
  0x9b   :  { %s1797_s21 = sld [smem:[#allocation4 + $0x32]]  ;;  %s1799_s16 = sld [smem:[#allocation4 + $0x33]] }
  0x9c   :  { %p428_p5 = scmp.gt.s32.totalorder %s1097_s15, 0  ;;  %p1098_p6 = scmp.lt.s32.totalorder %s1097_s15, 63  ;;  %v712_v20 = vsub.s32 0, %v711_v19 }
  0x9d   :  { %p437_p7 = scmp.gt.s32.totalorder %s1103_s0, 0  ;;  %p1104_p8 = scmp.lt.s32.totalorder %s1103_s0, 63 }
  0x9e   :  { %s2099_s15 = smov (!%p428_p5, %s1097_s15), 0  ;;  %p446_p9 = scmp.gt.s32.totalorder %s1782_s5, 0 }
  0x9f   :  { %s2101_s15 = smov (!%p1098_p6, %s2099_s15), 63  ;;  %s2103_s0 = smov (!%p437_p7, %s1103_s0), 0 }
  0xa0   :  { %s432_s30 = scalar_lea.vmem %s1956_s1, %s2101_s15  ;;  %s2105_s0 = smov (!%p1104_p8, %s2103_s0), 63 }
  0xa1   :  { %v433_v23 = vld [vmem:[%s432_s30] sm:$0x1]  ;;  %s447_s22 = scalar_select %p446_p9, %s1782_s5, 0 }
  0xa2   :  { %v434_v24 = vadd.f32 %v433_v23, %v425_v22  ;;  %s441_s18 = scalar_lea.vmem %s1956_s1, %s2105_s0  ;;  %p1110_p10 = scmp.lt.s32.totalorder %s1782_s5, 63 }
  0xa3   :  { %v442_v25 = vld [vmem:[%s441_s18] sm:$0x1]  ;;  %p455_p11 = scmp.gt.s32.totalorder %s1787_s9, 0  ;;  %p1116_p12 = scmp.lt.s32.totalorder %s1787_s9, 63 }
  0xa4   :  { %v443_v26 = vadd.f32 %v442_v25, %v434_v24  ;;  %s2107_s22 = smov (!%p1110_p10, %s447_s22), 63  ;;  %p464_p13 = scmp.gt.s32.totalorder %s1789_s11, 0 }
  0xa5   :  { %s2109_s9 = smov (!%p455_p11, %s1787_s9), 0  ;;  %s450_s13 = scalar_lea.vmem %s1956_s1, %s2107_s22 }
  0xa6   :  { %v451_v27 = vld [vmem:[%s450_s13] sm:$0x1]  ;;  %s2111_s9 = smov (!%p1116_p12, %s2109_s9), 63  ;;  %p1122_p0 = scmp.lt.s32.totalorder %s1789_s11, 63 }
  0xa7   :  { %v452_v28 = vadd.f32 %v451_v27, %v443_v26  ;;  %s465_s27 = scalar_select %p464_p13, %s1789_s11, 0 }
  0xa8   :  { %s459_s14 = scalar_lea.vmem %s1956_s1, %s2111_s9  ;;  %p473_p1 = scmp.gt.s32.totalorder %s1791_s12, 0 }
  0xa9   :  { %v460_v29 = vld [vmem:[%s459_s14] sm:$0x1]  ;;  %p1128_p2 = scmp.lt.s32.totalorder %s1791_s12, 63  ;;  %s2113_s27 = smov (!%p1122_p0, %s465_s27), 63 }
  0xaa   :  { %v461_v30 = vadd.f32 %v460_v29, %v452_v28  ;;  %s2115_s12 = smov (!%p473_p1, %s1791_s12), 0  ;;  %s468_s5 = scalar_lea.vmem %s1956_s1, %s2113_s27 }
  0xab   :  { %p485_p3 = scmp.gt.s32.totalorder %s1793_s20, 0  ;;  %v469_v31 = vld [vmem:[%s468_s5] sm:$0x1]  ;;  %s2117_s12 = smov (!%p1128_p2, %s2115_s12), 63 }
  0xac   :  { %v470_v32 = vadd.f32 %v469_v31, %v461_v30  ;;  %s477_s9 = scalar_lea.vmem %s1956_s1, %s2117_s12  ;;  %p1134_p4 = scmp.lt.s32.totalorder %s1793_s20, 63 }
  0xad   :  { %s486_s2 = scalar_select %p485_p3, %s1793_s20, 0  ;;  %v478_v33 = vld [vmem:[%s477_s9] sm:$0x1] }
  0xae   :  { %p494_p5 = scmp.gt.s32.totalorder %s1795_s10, 0  ;;  %p1140_p6 = scmp.lt.s32.totalorder %s1795_s10, 63  ;;  %v479_v34 = vadd.f32 %v478_v33, %v470_v32 }
  0xaf   :  { %s2119_s2 = smov (!%p1134_p4, %s486_s2), 63  ;;  %p503_p7 = scmp.gt.s32.totalorder %s1797_s21, 0 }
  0xb0   :  { %s2121_s10 = smov (!%p494_p5, %s1795_s10), 0  ;;  %v480_v35 = vmul.f32 0.125, %v479_v34  ;;  %s489_s29 = scalar_lea.vmem %s1956_s1, %s2119_s2 }
  0xb1   :  { %s2123_s10 = smov (!%p1140_p6, %s2121_s10), 63  ;;  %p1146_p8 = scmp.lt.s32.totalorder %s1797_s21, 63  ;;  %v490_v36 = vld [vmem:[%s489_s29] sm:$0x1] }
  0xb2   :  { %481 = vst.msk [vmem:[#allocation2 + $0x5] sm:$0x1] %vm105_vm1, %v480_v35  ;;  %s504_s12 = scalar_select %p503_p7, %s1797_s21, 0 }
  0xb3   :  { %s498_s22 = scalar_lea.vmem %s1956_s1, %s2123_s10  ;;  %p512_p9 = scmp.gt.s32.totalorder %s1799_s16, 0 }
  0xb4   :  { %p1152_p10 = scmp.lt.s32.totalorder %s1799_s16, 63  ;;  %s2125_s12 = smov (!%p1146_p8, %s504_s12), 63  ;;  %v499_v37 = vld [vmem:[%s498_s22] sm:$0x1] }
  0xb5   :  { %s2127_s16 = smov (!%p512_p9, %s1799_s16), 0  ;;  %s507_s18 = scalar_lea.vmem %s1956_s1, %s2125_s12  ;;  %v500_v38 = vadd.f32 %v499_v37, %v490_v36 }
  0xb6   :  { %s1157_s19 = sld [smem:[#allocation4 + $0x34]]  ;;  %s2129_s16 = smov (!%p1152_p10, %s2127_s16), 63  ;;  %v508_v39 = vld [vmem:[%s507_s18] sm:$0x1] }
  0xb7   :  { %s1163_s24 = sld [smem:[#allocation4 + $0x35]]  ;;  %s1853_s13 = sld [smem:[#allocation4 + $0x36]]  ;;  %v509_v40 = vadd.f32 %v508_v39, %v500_v38 }
  0xb8   :  { %s516_s21 = scalar_lea.vmem %s1956_s1, %s2129_s16  ;;  %s1858_s28 = sld [smem:[#allocation4 + $0x37]] }
  0xb9   :  { %s1860_s7 = sld [smem:[#allocation4 + $0x38]]  ;;  %s1862_s14 = sld [smem:[#allocation4 + $0x39]]  ;;  %v517_v41 = vld [vmem:[%s516_s21] sm:$0x1] }
  0xba   :  { %s1864_s15 = sld [smem:[#allocation4 + $0x3a]]  ;;  %s1866_s0 = sld [smem:[#allocation4 + $0x3b]]  ;;  %v518_v42 = vadd.f32 %v517_v41, %v509_v40 }
  0xbb   :  { %s1868_s5 = sld [smem:[#allocation4 + $0x3c]]  ;;  %s1870_s16 = sld [smem:[#allocation4 + $0x3d]] }
  0xbc   :  { %p521_p11 = scmp.gt.s32.totalorder %s1157_s19, 0  ;;  %p1158_p12 = scmp.lt.s32.totalorder %s1157_s19, 63 }
  0xbd   :  { %p530_p13 = scmp.gt.s32.totalorder %s1163_s24, 0  ;;  %p1164_p0 = scmp.lt.s32.totalorder %s1163_s24, 63 }
  0xbe   :  { %s2131_s19 = smov (!%p521_p11, %s1157_s19), 0  ;;  %p539_p1 = scmp.gt.s32.totalorder %s1853_s13, 0 }
  0xbf   :  { %s2133_s19 = smov (!%p1158_p12, %s2131_s19), 63  ;;  %s2135_s24 = smov (!%p530_p13, %s1163_s24), 0 }
  0xc0   :  { %s525_s8 = scalar_lea.vmem %s1956_s1, %s2133_s19  ;;  %s2137_s24 = smov (!%p1164_p0, %s2135_s24), 63 }
  0xc1   :  { %v526_v43 = vld [vmem:[%s525_s8] sm:$0x1]  ;;  %s540_s9 = scalar_select %p539_p1, %s1853_s13, 0 }
  0xc2   :  { %v527_v44 = vadd.f32 %v526_v43, %v518_v42  ;;  %s534_s29 = scalar_lea.vmem %s1956_s1, %s2137_s24  ;;  %p1170_p2 = scmp.lt.s32.totalorder %s1853_s13, 63 }
  0xc3   :  { %v535_v45 = vld [vmem:[%s534_s29] sm:$0x1]  ;;  %p548_p3 = scmp.gt.s32.totalorder %s1858_s28, 0  ;;  %p1176_p4 = scmp.lt.s32.totalorder %s1858_s28, 63 }
  0xc4   :  { %v536_v46 = vadd.f32 %v535_v45, %v527_v44  ;;  %s2139_s9 = smov (!%p1170_p2, %s540_s9), 63  ;;  %p560_p5 = scmp.gt.s32.totalorder %s1860_s7, 0 }
  0xc5   :  { %s2141_s28 = smov (!%p548_p3, %s1858_s28), 0  ;;  %s543_s20 = scalar_lea.vmem %s1956_s1, %s2139_s9 }
  0xc6   :  { %v544_v47 = vld [vmem:[%s543_s20] sm:$0x1]  ;;  %s2143_s28 = smov (!%p1176_p4, %s2141_s28), 63  ;;  %p1182_p6 = scmp.lt.s32.totalorder %s1860_s7, 63 }
  0xc7   :  { %v545_v48 = vadd.f32 %v544_v47, %v536_v46  ;;  %s561_s22 = scalar_select %p560_p5, %s1860_s7, 0 }
  0xc8   :  { %s552_s18 = scalar_lea.vmem %s1956_s1, %s2143_s28  ;;  %p569_p7 = scmp.gt.s32.totalorder %s1862_s14, 0 }
  0xc9   :  { %v553_v49 = vld [vmem:[%s552_s18] sm:$0x1]  ;;  %p1188_p8 = scmp.lt.s32.totalorder %s1862_s14, 63  ;;  %s2145_s22 = smov (!%p1182_p6, %s561_s22), 63 }
  0xca   :  { %v554_v50 = vadd.f32 %v553_v49, %v545_v48  ;;  %s2147_s14 = smov (!%p569_p7, %s1862_s14), 0  ;;  %s564_s13 = scalar_lea.vmem %s1956_s1, %s2145_s22 }
  0xcb   :  { %p578_p9 = scmp.gt.s32.totalorder %s1864_s15, 0  ;;  %s2149_s14 = smov (!%p1188_p8, %s2147_s14), 63  ;;  %v565_v52 = vld [vmem:[%s564_s13] sm:$0x1] }
  0xcc   :  { %v555_v51 = vmul.f32 0.125, %v554_v50  ;;  %s573_s28 = scalar_lea.vmem %s1956_s1, %s2149_s14  ;;  %p1194_p10 = scmp.lt.s32.totalorder %s1864_s15, 63 }
  0xcd   :  { %s579_s27 = scalar_select %p578_p9, %s1864_s15, 0  ;;  %v574_v53 = vld [vmem:[%s573_s28] sm:$0x1] }
  0xce   :  { %556 = vst.msk [vmem:[#allocation2 + $0x6] sm:$0x1] %vm105_vm1, %v555_v51  ;;  %p587_p11 = scmp.gt.s32.totalorder %s1866_s0, 0  ;;  %p1200_p12 = scmp.lt.s32.totalorder %s1866_s0, 63  ;;  %v575_v54 = vadd.f32 %v574_v53, %v565_v52 }
  0xcf   :  { %s2151_s27 = smov (!%p1194_p10, %s579_s27), 63  ;;  %p596_p13 = scmp.gt.s32.totalorder %s1868_s5, 0 }
  0xd0   :  { %s2153_s0 = smov (!%p587_p11, %s1866_s0), 0  ;;  %s582_s25 = scalar_lea.vmem %s1956_s1, %s2151_s27 }
  0xd1   :  { %s2155_s0 = smov (!%p1200_p12, %s2153_s0), 63  ;;  %v583_v55 = vld [vmem:[%s582_s25] sm:$0x1]  ;;  %p1206_p0 = scmp.lt.s32.totalorder %s1868_s5, 63 }
  0xd2   :  { %s597_s8 = scalar_select %p596_p13, %s1868_s5, 0  ;;  %v584_v56 = vadd.f32 %v583_v55, %v575_v54 }
  0xd3   :  { %s591_s15 = scalar_lea.vmem %s1956_s1, %s2155_s0  ;;  %p605_p1 = scmp.gt.s32.totalorder %s1870_s16, 0 }
  0xd4   :  { %p1212_p2 = scmp.lt.s32.totalorder %s1870_s16, 63  ;;  %s2157_s8 = smov (!%p1206_p0, %s597_s8), 63  ;;  %v592_v57 = vld [vmem:[%s591_s15] sm:$0x1] }
  0xd5   :  { %s2159_s16 = smov (!%p605_p1, %s1870_s16), 0  ;;  %s600_s29 = scalar_lea.vmem %s1956_s1, %s2157_s8  ;;  %v593_v58 = vadd.f32 %v592_v57, %v584_v56 }
  0xd6   :  { %s1217_s12 = sld [smem:[#allocation4 + $0x3e]]  ;;  %s2161_s16 = smov (!%p1212_p2, %s2159_s16), 63  ;;  %v601_v59 = vld [vmem:[%s600_s29] sm:$0x1] }
  0xd7   :  { %s1223_s30 = sld [smem:[#allocation4 + $0x3f]]  ;;  %s609_s0 = scalar_lea.vmem %s1956_s1, %s2161_s16  ;;  %v602_v60 = vadd.f32 %v601_v59, %v593_v58 }
  0xd8   :  { %v610_v61 = vld [vmem:[%s609_s0] sm:$0x1]  ;;  %s1436_s3 = smov [#allocation6]  }
  0xd9   :  { %v611_v62 = vadd.f32 %v610_v61, %v602_v60  ;;  %s774_s10 = sshll.u32 %s1436_s3, 4  ;;  %s775_s10 = int_to_ptr.vmem [resolvable:$true] %s774_s10 }
  0xda   :  { %s1406_s4 = scalar_lea.vmem %s775_s10, 16  ;;  %s1410_s21 = scalar_lea.vmem %s775_s10, 32 }
  0xdb   :  { %p1407_p7 = scmp.ne.s32.totalorder %s775_s10, %s1406_s4  ;;  %p1411_p8 = scmp.lt.s32.totalorder %s775_s10, %s775_s10 }
  0xdc   :  { %p614_p3 = scmp.gt.s32.totalorder %s1217_s12, 0  ;;  %p1218_p4 = scmp.lt.s32.totalorder %s1217_s12, 63 }
  0xdd   :  { %p623_p5 = scmp.gt.s32.totalorder %s1223_s30, 0  ;;  %p1224_p6 = scmp.lt.s32.totalorder %s1223_s30, 63 }
  0xde   :  { %s2163_s12 = smov (!%p614_p3, %s1217_s12), 0  ;;  %p1412_p9 = scmp.lt.s32.totalorder %s1410_s21, %s1406_s4 }
  0xdf   :  { %s2165_s12 = smov (!%p1218_p4, %s2163_s12), 63  ;;  %s2167_s30 = smov (!%p623_p5, %s1223_s30), 0 }
  0xe0   :  { %s618_s26 = scalar_lea.vmem %s1956_s1, %s2165_s12  ;;  %s2169_s30 = smov (!%p1224_p6, %s2167_s30), 63 }
  0xe1   :  { %v619_v63 = vld [vmem:[%s618_s26] sm:$0x1]  ;;  %s627_s16 = scalar_lea.vmem %s1956_s1, %s2169_s30  ;;  %p1413_p10 = por %p1412_p9, %p1411_p8 }
  0xe2   :  { %v620_v0 = vadd.f32 %v619_v63, %v611_v62  ;;  %v628_v1 = vld [vmem:[%s627_s16] sm:$0x1] }
  0xe3   :  { %p1414_p11 = pnand %p1413_p10, %p1407_p7 }
  0xe4   :  { %v629_v2 = vadd.f32 %v628_v1, %v620_v0 }
  0xe6   :  { %v630_v3 = vmul.f32 0.125, %v629_v2 }
  0xe8   :  { %631 = vst.msk [vmem:[#allocation2 + $0x7] sm:$0x1] %vm105_vm1, %v630_v3 }
  0xef   :  { %v632_v4 = vld [vmem:[#allocation2] sm:$0xff] }
  0xf0   :  { %v633_v5 = vpack.c.bf16 %v632_v4, %v632_v4 }
  0xf2   :  { %1373 = vmatmul.mubr.msk.bf16.vlgmr.msra.gmra.mrb[0].mxu0 %vm657_vm2, %v633_v5 }
 0x108   :  { %v708_v21 = vpop.permute.xlu0 %707 }
 0x109   :  { %v713_v22 = vrot.slane %v708_v21, %v712_v20 }
 0x1c5   :  { %v695_v9 = vpop.f32.mrb[0].mxu0 }
 0x1c6   :  { %v696_v10 = vadd.f32 %v1229_v8, %v695_v9  ;;  %v1374_v11 = vpop.f32.mrb[1].mxu0 }
 0x1c7   :  { %v698_v12 = vpop.f32.mrb[2].mxu0 }
 0x1c8   :  { %v701_v13 = vmax.f32 %v696_v10, 0.0  ;;  %v1375_v14 = vpop.f32.mrb[3].mxu0 }
 0x1ca   :  { %v703_v15 = vpack.c.bf16 %v701_v13, %v701_v13 }
 0x1cc   :  { %v718_v16 = vsel %vm657_vm2, %v703_v15, 0 }
 0x1cd   :  { %1377 = vmatpush3.bf16.xpose.msra.mxu1 %v718_v16 }
 0x1d4   :  { %1379 = vmatmul.mubr.msk.bf16.vlgmr.msra.gmra.mrb[0].mxu1 %vm657_vm2, %v702_v17 }
 0x2a7   :  { %v754_v23 = vpop.f32.mrb[0].mxu1 }
 0x2a8   :  { %v755_v24 = vadd.f32 %v754_v23, %v713_v22  ;;  %v1380_v25 = vpop.f32.mrb[1].mxu1 }
 0x2a9   :  { %v757_v26 = vpop.f32.mrb[2].mxu1 }
 0x2aa   :  { %v1234_v27 = vmul.f32 -1.442695, %v755_v24  ;;  %v1381_v28 = vpop.f32.mrb[3].mxu1 }
 0x2ac   :  { %1390 = vpow2.f32 %v1234_v27 }
 0x2b6   :  { %v1391_v29 = vpop.eup %1390 }
 0x2b7   :  { %v763_v30 = vadd.f32 1.0, %v1391_v29 }
 0x2b9   :  { %1392 = vrcp.f32 %v763_v30 }
 0x2c3   :  { %v1393_v31 = vpop.eup %1392 }
 0x2c4   :  { %767 = vst.msk [vmem:[#allocation6] sm:$0x1] %vm766_vm3, %v1393_v31 }
 0x2c5   :  { %1417 = shalt.err (!%p1414_p11)
}
 0x2c6   :  { %s1418_s2 = scalar_lea.hbm %s1960_s6, 16 }
 0x2c7   :  { %p1419_p12 = scmp.ne.s32.totalorder %s1960_s6, %s1418_s2  ;;  %p1422_p13 = scmp.lt.u32.totalorder %s1418_s2, %s1960_s6 }
 0x2c9   :  { %p1424_p0 = pnand %p1422_p13, %p1419_p12 }
 0x2cb   :  { %1427 = shalt.err (!%p1424_p0)
}
 0x2cc   :  { %777 = dma.vmem_to_hbm [thread:$0]  %s775_s10, 16, %s1960_s6, [#allocation7]  }
 0x2cd   :  { %1430 = dma.done.wait [#allocation7], 16  }
 0x2ce   :  { %1431 = vsyncadd [#allocation7], 4294967280 }
 0x2cf   :  { %781 = vsyncpa [#allocation7], 1 }

</bundles_post_ra>
